<compile_context>
chip_gen: v7x
topology: tpu7x:2x2x1
jax: 0.10.0
libtpu: 0.0.40
codegen_flags: <defaults>
</compile_context>

<pallas_src>
from functools import partial

import jax
import jax.numpy as jnp
from jax.experimental import pallas as pl
from jax.experimental.pallas import tpu as pltpu

IN_DIM = 2
OUT_DIM = 1
HIDDEN_DIM = 32
LATENT_DIM = 64
N_HIDDEN = 3                       # n_hidden_linears (>= 2 assumed by the folds below)
XF_DIM = HIDDEN_DIM * N_HIDDEN     # folded layer-0 + (N_HIDDEN-1) filters, fused on sublanes
XK = IN_DIM + 1                    # x augmented with a ones row (bias fold)


def _round_up(x, m):
    return ((x + m - 1) // m) * m


def _choose_tile(N, B, requested):
    """Multiple of 128, <= padded N, and small enough that the grid has >= ~8 steps."""
    req = max(128, _round_up(requested, 128))
    n_ceil = _round_up(N, 128)
    min_steps_per_batch = max(1, -(-8 // max(B, 1)))          # ceil(8 / B)
    cap = max(128, _round_up(-(-N // min_steps_per_batch), 128))
    return min(req, n_ceil, cap)


def _inr_kernel(x_ref, add_ref, last_b_ref, xw_ref, mid_w_ref, last_w_ref, o_ref):
    """One (batch, N-tile) step; channels on sublanes, points on lanes.

    x_ref      : (1, XK, TILE_N)             bf16  [x0; x1; 1] per point, lane-dense
    add_ref    : (1, N_HIDDEN-1, H, 1)       f32   mod_i(z)+mod_b_i+lin_b_i, i < N_HIDDEN-1
    last_b_ref : (1, OUT_DIM, 1)             f32   dec_w@(mod_last(z)+mod_b+lin_b)+dec_b
    xw_ref     : (XF_DIM, XK)                bf16  [[lin_w0@enc_w | lin_w0@enc_b];
                                                    [filt_w_i     | filt_b_i    ] ...]
    mid_w_ref  : (max(N_HIDDEN-2,1), H, H)   bf16  hidden linears 1 .. N_HIDDEN-2
    last_w_ref : (OUT_DIM, H)                bf16  dec_w @ lin_w[-1]
    o_ref      : (1, OUT_DIM, TILE_N)        f32   lane-dense output
    """
    x = x_ref[0]                                                   # (XK, TILE_N) bf16

    # Single fused x-matmul: folded layer-0 pre-activation + all filter pre-activations,
    # biases included via the ones row of x.
    pre = jnp.dot(xw_ref[...], x, preferred_element_type=jnp.float32)   # (XF_DIM, T) f32

    # Slices below are 32-row (8-sublane-aligned) views; no VMEM copies expected.
    filt = jnp.sin(pre[HIDDEN_DIM:])                               # (64, T) f32, one pass

    # Layer 0 (lin0 already folded into the x-matmul): add modulation, apply filter 0.
    y = (pre[:HIDDEN_DIM] + add_ref[0, 0]) * filt[:HIDDEN_DIM]     # (H, T)

    # Middle hidden layers 1 .. N_HIDDEN-2 (one layer for N_HIDDEN=3).
    for i in range(1, N_HIDDEN - 1):
        y = jnp.dot(mid_w_ref[i - 1], y.astype(jnp.bfloat16),
                    preferred_element_type=jnp.float32)            # (H, T)
        y = (y + add_ref[0, i]) * filt[i * HIDDEN_DIM:(i + 1) * HIDDEN_DIM]

    # Last hidden layer + decode, folded into one (OUT_DIM, H) matmul + per-batch bias.
    out = jnp.dot(last_w_ref[...], y.astype(jnp.bfloat16),
                  preferred_element_type=jnp.float32) + last_b_ref[0]
    o_ref[0] = out.astype(o_ref.dtype)


@partial(jax.jit, static_argnames=("tile_n",))
def abstract_inr_forward(x_coords, latent_code, params, *, tile_n=4096):
    """x_coords: (B, N, IN_DIM) f32; latent_code: (B, 1, LATENT_DIM) f32 -> (B, N, OUT_DIM)."""
    B, N, in_dim = x_coords.shape
    assert in_dim == IN_DIM and N_HIDDEN >= 2
    (enc_w, enc_b, lin_w, lin_b, mod_w, mod_b, filt_w, filt_b, dec_w, dec_b) = params

    # ---- tiny, N-independent precompute (all folds in f32, single bf16 cast) ----------
    z = latent_code[:, 0, :]                                       # (B, L)
    add_all = (jnp.einsum('bl,ihl->bih', z, mod_w) + mod_b[None] + lin_b[None])  # (B,NH,H)
    add = add_all[:, :N_HIDDEN - 1, :, None].astype(jnp.float32)   # (B, NH-1, H, 1)

    # decode folded into the last hidden layer
    last_w = (dec_w @ lin_w[-1]).astype(jnp.bfloat16)              # (OUT_DIM, H)
    last_b = (jnp.einsum('oh,bh->bo', dec_w, add_all[:, -1])
              + dec_b[None])[:, :, None].astype(jnp.float32)       # (B, OUT_DIM, 1)

    # first hidden layer folded into encode; biases as an extra weight column
    w0 = lin_w[0] @ enc_w                                          # (H, IN_DIM)
    b0 = lin_w[0] @ enc_b                                          # (H,)
    xw = jnp.concatenate([
        jnp.concatenate([w0, b0[:, None]], axis=1),                            # (H, XK)
        jnp.concatenate([filt_w.reshape(-1, IN_DIM),
                         filt_b.reshape(-1)[:, None]], axis=1),                # (64, XK)
    ], axis=0).astype(jnp.bfloat16)                                # (XF_DIM, XK)

    if N_HIDDEN > 2:
        mid_w = lin_w[1:-1].astype(jnp.bfloat16)                   # (NH-2, H, H)
    else:
        mid_w = jnp.zeros((1, HIDDEN_DIM, HIDDEN_DIM), jnp.bfloat16)  # never read

    # ---- lane-dense x layout: transpose + bf16 cast + ones row + pad, fused under jit --
    tile_n = _choose_tile(N, B, tile_n)
    n_pad = _round_up(N, tile_n)
    x_t = jnp.concatenate(
        [jnp.transpose(x_coords, (0, 2, 1)).astype(jnp.bfloat16),
         jnp.ones((B, 1, N), jnp.bfloat16)], axis=1)               # (B, XK, N)
    if n_pad != N:
        x_t = jnp.pad(x_t, ((0, 0), (0, 0), (0, n_pad - N)))

    grid = (B, n_pad // tile_n)

    def const_spec(a):
        nd = a.ndim
        return pl.BlockSpec(a.shape, lambda b, n, _nd=nd: (0,) * _nd)

    out = pl.pallas_call(
        _inr_kernel,
        out_shape=jax.ShapeDtypeStruct((B, OUT_DIM, n_pad), jnp.float32),
        grid_spec=pltpu.PrefetchScalarGridSpec(
            num_scalar_prefetch=0,
            grid=grid,
            in_specs=[
                pl.BlockSpec((1, XK, tile_n), lambda b, n: (b, 0, n)),
                pl.BlockSpec((1, N_HIDDEN - 1, HIDDEN_DIM, 1), lambda b, n: (b, 0, 0, 0)),
                pl.BlockSpec((1, OUT_DIM, 1), lambda b, n: (b, 0, 0)),
                const_spec(xw),
                const_spec(mid_w),
                const_spec(last_w),
            ],
            out_specs=pl.BlockSpec((1, OUT_DIM, tile_n), lambda b, n: (b, 0, n)),
        ),
        # ~0.9 KB/point of live intermediates: tile_n=4096 is ~4 MiB (fits v5e's 16 MiB
        # scoped default); only bump the limit for larger tiles (v5e caveat from review).
        compiler_params=pltpu.CompilerParams(
            dimension_semantics=("parallel", "parallel"),
            vmem_limit_bytes=(32 * 1024 * 1024) if tile_n > 4096 else None),
    )(x_t, add, last_b, xw, mid_w, last_w)

    return jnp.transpose(out[:, :, :N], (0, 2, 1))                 # (B, N, OUT_DIM)


def init_params(key):
    """Deterministic PyTorch-nn.Linear-style init; weights stored (out, in), biases (out,)."""
    ks = jax.random.split(key, 5)

    def linear(k, fan_in, fan_out):
        kw, kb = jax.random.split(k)
        bound = 1.0 / jnp.sqrt(jnp.float32(fan_in))
        w = jax.random.uniform(kw, (fan_out, fan_in), jnp.float32, -bound, bound)
        b = jax.random.uniform(kb, (fan_out,), jnp.float32, -bound, bound)
        return w, b

    enc_w, enc_b = linear(ks[0], IN_DIM, HIDDEN_DIM)
    dec_w, dec_b = linear(ks[1], HIDDEN_DIM, OUT_DIM)
    lin = [linear(k, HIDDEN_DIM, HIDDEN_DIM) for k in jax.random.split(ks[2], N_HIDDEN)]
    mod = [linear(k, LATENT_DIM, HIDDEN_DIM) for k in jax.random.split(ks[3], N_HIDDEN)]
    flt = [linear(k, IN_DIM, HIDDEN_DIM) for k in jax.random.split(ks[4], N_HIDDEN - 1)]

    lin_w = jnp.stack([w for w, _ in lin]); lin_b = jnp.stack([b for _, b in lin])
    mod_w = jnp.stack([w for w, _ in mod]); mod_b = jnp.stack([b for _, b in mod])
    filt_w = jnp.stack([w for w, _ in flt]); filt_b = jnp.stack([b for _, b in flt])
    return (enc_w, enc_b, lin_w, lin_b, mod_w, mod_b, filt_w, filt_b, dec_w, dec_b)


def reference_forward(x_coords, latent_code, params):
    """Pure-f32, layer-by-layer reference faithful to the PyTorch forward."""
    (enc_w, enc_b, lin_w, lin_b, mod_w, mod_b, filt_w, filt_b, dec_w, dec_b) = params
    y = x_coords @ enc_w.T + enc_b
    for i in range(N_HIDDEN - 1):
        y = y @ lin_w[i].T + lin_b[i]
        y = y + (latent_code @ mod_w[i].T + mod_b[i])
        y = y * jnp.sin(x_coords @ filt_w[i].T + filt_b[i])
    y = y @ lin_w[-1].T + lin_b[-1]
    y = y + (latent_code @ mod_w[-1].T + mod_b[-1])
    return y @ dec_w.T + dec_b


if __name__ == "__main__":
    key = jax.random.PRNGKey(0)
    k_p, k_x, k_z = jax.random.split(key, 3)

    B, N = 2, 1000   # N not a multiple of the tile -> exercises padding + tile clamping
    params = init_params(k_p)
    x_coords = jax.random.uniform(k_x, (B, N, IN_DIM), jnp.float32, -1.0, 1.0)
    latent_code = jax.random.normal(k_z, (B, 1, LATENT_DIM), jnp.float32)

    out = abstract_inr_forward(x_coords, latent_code, params)
    out = jax.block_until_ready(out)

    ref = reference_forward(x_coords, latent_code, params)
    assert out.shape == (B, N, OUT_DIM)
    max_err = float(jnp.max(jnp.abs(out - ref)))
    # Kernel uses bf16 at the MXU inputs (incl. bf16 coordinates) with f32 accumulation;
    # tolerance reflects that mixed precision vs. the pure-f32 reference.
    assert jnp.allclose(out, ref, atol=2e-2, rtol=2e-2), f"max_err={max_err}"

    print("KERNEL_OK")
</pallas_src>

<mosaic_0001>
module attributes {stable_mosaic.version = 11 : i64} {
  func.func @_inr_kernel(%arg0: i32, %arg1: i32, %arg2: memref<1x3x256xbf16, #tpu.memory_space<vmem>>, %arg3: memref<1x2x32x1xf32, #tpu.memory_space<vmem>>, %arg4: memref<1x1x1xf32, #tpu.memory_space<vmem>>, %arg5: memref<96x3xbf16, #tpu.memory_space<vmem>>, %arg6: memref<1x32x32xbf16, #tpu.memory_space<vmem>>, %arg7: memref<1x32xbf16, #tpu.memory_space<vmem>>, %arg8: memref<1x1x256xf32, #tpu.memory_space<vmem>>) attributes {dimension_semantics = [#tpu.dimension_semantics<parallel>, #tpu.dimension_semantics<parallel>], iteration_bounds = array<i64: 2, 4>, scalar_prefetch = 0 : i64, scratch_operands = 0 : i64, tpu.core_type = #tpu.core_type<tc>, window_params = [{transform_indices = @transform_0, window_bounds = array<i64: 1, 3, 256>}, {transform_indices = @transform_1, window_bounds = array<i64: 1, 2, 32, 1>}, {transform_indices = @transform_2, window_bounds = array<i64: 1, 1, 1>}, {pipeline_mode = #tpu.pipeline_mode<synchronous>, transform_indices = @transform_3, window_bounds = array<i64: 96, 3>}, {pipeline_mode = #tpu.pipeline_mode<synchronous>, transform_indices = @transform_4, window_bounds = array<i64: 1, 32, 32>}, {pipeline_mode = #tpu.pipeline_mode<synchronous>, transform_indices = @transform_5, window_bounds = array<i64: 1, 32>}, {transform_indices = @transform_6, window_bounds = array<i64: 1, 1, 256>}]} {
    %c0 = arith.constant 0 : index
    %c0_0 = arith.constant 0 : index
    %c0_1 = arith.constant 0 : index
    %0 = vector.load %arg2[%c0, %c0_0, %c0_1] : memref<1x3x256xbf16, #tpu.memory_space<vmem>>, vector<1x3x256xbf16>
    %1 = vector.shape_cast %0 : vector<1x3x256xbf16> to vector<3x256xbf16>
    %c0_2 = arith.constant 0 : index
    %c0_3 = arith.constant 0 : index
    %2 = vector.load %arg5[%c0_2, %c0_3] : memref<96x3xbf16, #tpu.memory_space<vmem>>, vector<96x3xbf16>
    %cst = arith.constant dense<0.000000e+00> : vector<96x256xf32>
    %3 = tpu.matmul %2, %1, %cst {dimension_numbers = #tpu.dot_dimension_numbers<[1], [0], [0], [1], [0, 0, 1, 1], [], []>} : vector<96x3xbf16>, vector<3x256xbf16>, vector<96x256xf32> -> vector<96x256xf32>
    %4 = vector.extract_strided_slice %3 {offsets = [32, 0], sizes = [64, 256], strides = [1, 1]} : vector<96x256xf32> to vector<64x256xf32>
    %5 = math.sin %4 : vector<64x256xf32>
    %6 = vector.extract_strided_slice %3 {offsets = [0, 0], sizes = [32, 256], strides = [1, 1]} : vector<96x256xf32> to vector<32x256xf32>
    %c0_4 = arith.constant 0 : index
    %c0_5 = arith.constant 0 : index
    %c0_6 = arith.constant 0 : index
    %c0_7 = arith.constant 0 : index
    %7 = vector.load %arg3[%c0_4, %c0_5, %c0_6, %c0_7] : memref<1x2x32x1xf32, #tpu.memory_space<vmem>>, vector<1x1x32x1xf32>
    %8 = vector.shape_cast %7 : vector<1x1x32x1xf32> to vector<32x1xf32>
    %9 = vector.broadcast %8 : vector<32x1xf32> to vector<32x256xf32>
    %10 = arith.addf %6, %9 : vector<32x256xf32>
    %11 = vector.extract_strided_slice %5 {offsets = [0, 0], sizes = [32, 256], strides = [1, 1]} : vector<64x256xf32> to vector<32x256xf32>
    %12 = arith.mulf %10, %11 : vector<32x256xf32>
    %c0_8 = arith.constant 0 : index
    %c0_9 = arith.constant 0 : index
    %c0_10 = arith.constant 0 : index
    %13 = vector.load %arg6[%c0_8, %c0_9, %c0_10] : memref<1x32x32xbf16, #tpu.memory_space<vmem>>, vector<1x32x32xbf16>
    %14 = vector.shape_cast %13 : vector<1x32x32xbf16> to vector<32x32xbf16>
    %15 = arith.truncf %12 : vector<32x256xf32> to vector<32x256xbf16>
    %cst_11 = arith.constant dense<0.000000e+00> : vector<32x256xf32>
    %16 = tpu.matmul %14, %15, %cst_11 {dimension_numbers = #tpu.dot_dimension_numbers<[1], [0], [0], [1], [0, 0, 1, 1], [], []>} : vector<32x32xbf16>, vector<32x256xbf16>, vector<32x256xf32> -> vector<32x256xf32>
    %c0_12 = arith.constant 0 : index
    %c1 = arith.constant 1 : index
    %c0_13 = arith.constant 0 : index
    %c0_14 = arith.constant 0 : index
    %17 = vector.load %arg3[%c0_12, %c1, %c0_13, %c0_14] : memref<1x2x32x1xf32, #tpu.memory_space<vmem>>, vector<1x1x32x1xf32>
    %18 = vector.shape_cast %17 : vector<1x1x32x1xf32> to vector<32x1xf32>
    %19 = vector.broadcast %18 : vector<32x1xf32> to vector<32x256xf32>
    %20 = arith.addf %16, %19 : vector<32x256xf32>
    %21 = vector.extract_strided_slice %5 {offsets = [32, 0], sizes = [32, 256], strides = [1, 1]} : vector<64x256xf32> to vector<32x256xf32>
    %22 = arith.mulf %20, %21 : vector<32x256xf32>
    %c0_15 = arith.constant 0 : index
    %c0_16 = arith.constant 0 : index
    %23 = vector.load %arg7[%c0_15, %c0_16] : memref<1x32xbf16, #tpu.memory_space<vmem>>, vector<1x32xbf16>
    %24 = arith.truncf %22 : vector<32x256xf32> to vector<32x256xbf16>
    %cst_17 = arith.constant dense<0.000000e+00> : vector<1x256xf32>
    %25 = tpu.matmul %23, %24, %cst_17 {dimension_numbers = #tpu.dot_dimension_numbers<[1], [0], [0], [1], [0, 0, 1, 1], [], []>} : vector<1x32xbf16>, vector<32x256xbf16>, vector<1x256xf32> -> vector<1x256xf32>
    %c0_18 = arith.constant 0 : index
    %c0_19 = arith.constant 0 : index
    %c0_20 = arith.constant 0 : index
    %26 = vector.load %arg4[%c0_18, %c0_19, %c0_20] : memref<1x1x1xf32, #tpu.memory_space<vmem>>, vector<1x1x1xf32>
    %27 = vector.shape_cast %26 : vector<1x1x1xf32> to vector<1x1xf32>
    %28 = vector.broadcast %27 : vector<1x1xf32> to vector<1x256xf32>
    %29 = arith.addf %25, %28 : vector<1x256xf32>
    %c0_21 = arith.constant 0 : index
    %c0_22 = arith.constant 0 : index
    %c0_23 = arith.constant 0 : index
    %30 = vector.load %arg8[%c0_21, %c0_22, %c0_23] : memref<1x1x256xf32, #tpu.memory_space<vmem>>, vector<1x1x256xf32>
    %31 = vector.shape_cast %30 : vector<1x1x256xf32> to vector<1x256xf32>
    %32 = vector.shape_cast %29 : vector<1x256xf32> to vector<1x1x256xf32>
    tpu.vector_store %arg8[%c0_21, %c0_22, %c0_23], %32 {strides = array<i32>} : memref<1x1x256xf32, #tpu.memory_space<vmem>>, vector<1x1x256xf32>,
    return
  }
  func.func @transform_0(%arg0: i32, %arg1: i32) -> (i32, i32, i32) {
    %c0_i32 = arith.constant 0 : i32
    %c0_i32_0 = arith.constant 0 : i32
    return %arg0, %c0_i32, %arg1 : i32, i32, i32
  }
  func.func @transform_1(%arg0: i32, %arg1: i32) -> (i32, i32, i32, i32) {
    %c0_i32 = arith.constant 0 : i32
    %c0_i32_0 = arith.constant 0 : i32
    %c0_i32_1 = arith.constant 0 : i32
    %c0_i32_2 = arith.constant 0 : i32
    return %arg0, %c0_i32, %c0_i32_0, %c0_i32_1 : i32, i32, i32, i32
  }
  func.func @transform_2(%arg0: i32, %arg1: i32) -> (i32, i32, i32) {
    %c0_i32 = arith.constant 0 : i32
    %c0_i32_0 = arith.constant 0 : i32
    %c0_i32_1 = arith.constant 0 : i32
    return %arg0, %c0_i32, %c0_i32_0 : i32, i32, i32
  }
  func.func @transform_3(%arg0: i32, %arg1: i32) -> (i32, i32) {
    %c0_i32 = arith.constant 0 : i32
    %c0_i32_0 = arith.constant 0 : i32
    %c0_i32_1 = arith.constant 0 : i32
    return %c0_i32, %c0_i32_0 : i32, i32
  }
  func.func @transform_4(%arg0: i32, %arg1: i32) -> (i32, i32, i32) {
    %c0_i32 = arith.constant 0 : i32
    %c0_i32_0 = arith.constant 0 : i32
    %c0_i32_1 = arith.constant 0 : i32
    %c0_i32_2 = arith.constant 0 : i32
    return %c0_i32, %c0_i32_0, %c0_i32_1 : i32, i32, i32
  }
  func.func @transform_5(%arg0: i32, %arg1: i32) -> (i32, i32) {
    %c0_i32 = arith.constant 0 : i32
    %c0_i32_0 = arith.constant 0 : i32
    %c0_i32_1 = arith.constant 0 : i32
    return %c0_i32, %c0_i32_0 : i32, i32
  }
  func.func @transform_6(%arg0: i32, %arg1: i32) -> (i32, i32, i32) {
    %c0_i32 = arith.constant 0 : i32
    %c0_i32_0 = arith.constant 0 : i32
    return %arg0, %c0_i32, %arg1 : i32, i32, i32
  }
}

</mosaic_0001>

<bundles_post_ra>
// kernel: abstract_inr_forward.1
= control target key start
LH: loop header
LB: loop body
LE: loop exit
PB: predicated region body
PF: predicated region fallthrough
CT: control target
= control target key end

     0   :  { %s2874_s21 = smov 0   ;;  %s2876_s22 = smov 0   ;;  %s4625_s0 = inlined_call_operand.vmem [shape: bf16[2,3,1024], index: 0, kind: input, shape index: {}]   ;;  %s4626_s1 = inlined_call_operand.vmem [shape: f32[2,2,32,1], index: 1, kind: input, shape index: {}]   ;;  %s4627_s2 = inlined_call_operand.vmem [shape: f32[2,1,1], index: 2, kind: input, shape index: {}]   ;;  %s4628_s3 = inlined_call_operand.vmem [shape: bf16[96,3], index: 3, kind: input, shape index: {}]   ;;  %s4629_s4 = inlined_call_operand.vmem [shape: bf16[1,32,32], index: 4, kind: input, shape index: {}]   ;;  %s4630_s5 = inlined_call_operand.vmem [shape: bf16[1,32], index: 5, kind: input, shape index: {}]   ;;  %s4631_s6 = inlined_call_operand.vmem [shape: f32[2,1,1024], index: 6, kind: output, shape index: {}]  }
   0x1   :  { %s2878_s23 = smov 0   ;;  %s2880_s24 = smov 0  }
   0x2   :  { %s2882_s25 = smov 0  }
   0x3 LB: > { %s25_s26 = sadd.s32 1, %s2820_s23  ;;  %s28_s27 = sadd.s32 1, %s2824_s24  ;;  %s2828_s25 = sphi %s2882_s25, %s16_s25   ;;  %s2824_s24 = sphi %s2880_s24, %s4728_s24   ;;  %s2820_s23 = sphi %s2878_s23, %s4727_s23   ;;  %s2816_s22 = sphi %s2876_s22, %s4726_s22   ;;  %s2812_s21 = sphi %s2874_s21, %s4725_s21  }
   0x4   : > { %p26_p0 = scmp.ge.s32.totalorder %s25_s26, 4  ;;  %p2504_p1 = scmp.ge.s32.totalorder %s2828_s25, 1 }
   0x5   : > { %p251_p2 = scmp.lt.s32.totalorder %s2828_s25, 9 }
   0x6   : > { %s4730_s26 = smov (%p26_p0, %s25_s26), 0  ;;  %s4732_s27 = smov (!%p26_p0, %s28_s27), %s2824_s24 }
   0x7   : > { %p252_p3 = pnand %p2504_p1, %p251_p2  ;;  %p30_p4 = scmp.ge.s32.totalorder %s4732_s27, 2 }
   0x9   : > { %s4734_s27 = smov (%p30_p4, %s4732_s27), 0  ;;  %255 = sbr.rel (%p252_p3) target bundleno = 962 (0x3c2), region = 44 }
  0x10   : > { %s2505_s28 = sshll.u32 %s2812_s21, 1  ;;  %p297_p5 = scmp.lt.s32.totalorder %s2816_s22, 1  ;;  %vm395_vm0 = vcmask 1040384   ;;  %v4632_v0 = vmov 0   ;;  %vm396_vm1 = vcmask 1041408   ;;  %v2831_v1 = vmov 65535  }
  0x11   : > { %p299_p6 = scmp.lt.s32.totalorder %s2505_s28, 7  ;;  %437 = vmatprep.mubr.bf16.mxu0 %v4632_v0  ;;  %2716 = vset.pattern.permute.xlu0 %v4632_v0  ;;  %v397_v2 = vsel %vm395_vm0, 4294967295, %v2831_v1  ;;  %v2718_v14 = vld [vmem:[%s4628_s3] sm:$0xff]   ;;  %v2723_v15 = vld [vmem:[%s4628_s3 + $0x28] sm:$0xff]   ;;  %vm376_vm2 = vcmask 23552   ;;  %v2720_v20 = vld [vmem:[%s4628_s3 + $0x10] sm:$0xff]  }
  0x12   : > { %s4736_s22 = smov (!%p297_p5, %s2816_s22), 1  ;;  %2717 = vset.pattern.permute.xlu1 %v4632_v0  ;;  %487 = vmatprep.mubr.bf16.mxu1 %v4632_v0  ;;  %v398_v5 = vsel %vm396_vm1, %v397_v2, 0  ;;  %v2719_v19 = vld [vmem:[%s4628_s3 + $0x8] sm:$0xff]   ;;  %v2721_v21 = vld [vmem:[%s4628_s3 + $0x18] sm:$0xff]   ;;  %v2722_v22 = vld [vmem:[%s4628_s3 + $0x20] sm:$0xff]  }
  0x13   : > { %s4738_s28 = smov (!%p299_p6, %s2505_s28), 7  ;;  %s2506_s29 = sshll.u32 %s4736_s22, 3  ;;  %v4660_v1 = vmov 683565275  }
  0x14   : > { %s2600_s30 = sshll.u32 %s4736_s22, 6  ;;  %s2912_s7 = sadd.s32 %s2506_s29, %s4738_s28 }
  0x15   : > { %s310_s10 = scalar_lea.vmem %s4626_s1, %s2600_s30  ;;  %s2507_s11 = sshll.u32 %s2912_s7, 1 }
  0x16   : > { %v2162_v3 = vld [vmem:[%s310_s10] sm:$0xff]  ;;  %v2164_v4 = vld [vmem:[%s310_s10 + $0x10] sm:$0xff]  ;;  %s304_s14 = scalar_lea.vmem %s4625_s0, %s2507_s11  ;;  %v2163_v7 = vld [vmem:[%s310_s10 + $0x8] sm:$0xff]  ;;  %s313_s21 = scalar_lea.vmem %s4627_s2, %s4736_s22 }
  0x17   : > { %2168 = vperm.xlu0 %2716, %v2162_v3   ;;  %2178 = vperm.xlu1 %2717, %v2164_v4   ;;  %v2518_v6 = vld.sshfl [vmem:[%s304_s14] sm:$0x33 pattern:$0x76325410]  ;;  %v2165_v8 = vld [vmem:[%s310_s10 + $0x18] sm:$0xff]  ;;  %v2590_v13 = vld [vmem:[%s310_s10 + $0x28] sm:$0xff]  ;;  %s321_s20 = scalar_lea.vmem %s4631_s6, %s2912_s7 }
  0x18   : > { %v375_v9 = vcombine.high %v2518_v6, %v2518_v6  ;;  %v400_v10 = vand.u32 %v2518_v6, %v398_v5  ;;  %v2589_v12 = vld [vmem:[%s310_s10 + $0x20] sm:$0xff]  ;;  %v2591_v16 = vld [vmem:[%s310_s10 + $0x30] sm:$0xff]  ;;  %v2592_v17 = vld [vmem:[%s310_s10 + $0x38] sm:$0xff] }
  0x19   : > { %v2318_v18 = vld [vmem:[%s313_s21] sm:$0x1] }
  0x1a   : > { %v403_v11 = vand.u32 %v398_v5, %v375_v9  ;;  %v4639_v5 = vmov 2475754826   ;;  %v4643_v9 = vmov 2102212464  }
  0x1b   : > { %2173 = vperm.xlu0 %2716, %v2163_v7   ;;  %2183 = vperm.xlu1 %2717, %v2165_v8   ;;  %v4641_v7 = vmov 2131351028  }
  0x1c   : > { %405 = vmatprep.subr.bf16.mxu0 %v403_v11  ;;  %2601 = vmatprep.subr.bf16.mxu1 %v403_v11  ;;  %v4653_v11 = vmov 920167782  }
  0x1d   : > { %406 = vmatpush1.bf16.msra.mxu0 %v400_v10  ;;  %2602 = vmatpush1.bf16.msra.mxu1 %v400_v10 }
  0x1f   : > { %2217 = vperm.xlu0 %2716, %v2589_v12   ;;  %2222 = vperm.xlu1 %2717, %v2590_v13  }
  0x20   : > { %2519 = vmatmul.mubr.msk.bf16.vlgmr.msra.gmra.mrb[0].mxu0 %vm376_vm2, %v2718_v14  ;;  %2524 = vmatmul.mubr.msk.bf16.vlgmr.msra.gmra.mrb[0].mxu1 %vm376_vm2, %v2723_v15 }
  0x21   : > { %447 = vmatprep.mubr.bf16.mxu0 %v4632_v0  ;;  %2284 = vmatprep.mubr.bf16.mxu1 %v4632_v0 }
  0x23   : > { %2227 = vperm.xlu0 %2716, %v2591_v16   ;;  %2232 = vperm.xlu1 %2717, %v2592_v17  }
  0x27   : > { %2321 = vperm.xlu0 %2716, %v2318_v18   ;;  %v4637_v18 = vmov 1326507024  }
  0x28   : > { %2520 = vmatmul.mubr.msk.bf16.gmra.mrb[4].mxu0 %vm376_vm2, %v2719_v19 }
  0x29   : > { %457 = vmatprep.mubr.bf16.mxu0 %v4632_v0 }
  0x30   : > { %2521 = vmatmul.mubr.msk.bf16.gmra.mrb[8].mxu0 %vm376_vm2, %v2720_v20 }
  0x31   : > { %467 = vmatprep.mubr.bf16.mxu0 %v4632_v0 }
  0x38   : > { %2522 = vmatmul.mubr.msk.bf16.gmra.mrb[12].mxu0 %vm376_vm2, %v2721_v21 }
  0x39   : > { %477 = vmatprep.mubr.bf16.mxu0 %v4632_v0 }
  0x40   : > { %2523 = vmatmul.mubr.msk.bf16.gmra.mrb[16].mxu0 %vm376_vm2, %v2722_v22 }
  0xf3   : > { %v2954_v23 = vpop.f32.mrb[0].mxu0 }
  0xf4   : > { %v2956_v24 = vpop.f32.mrb[1].mxu0 }
  0xf5   : > { %v2958_v25 = vpop.f32.mrb[2].mxu0 }
  0xf6   : > { %v2960_v26 = vpop.f32.mrb[3].mxu0 }
  0xfb   : > { %v2962_v27 = vpop.f32.mrb[4].mxu0 }
  0xfc   : > { %v2964_v28 = vpop.f32.mrb[5].mxu0 }
  0xfd   : > { %v2966_v29 = vpop.f32.mrb[6].mxu0 }
  0xfe   : > { %v2968_v30 = vpop.f32.mrb[7].mxu0 }
 0x103   : > { %v2970_v31 = vpop.f32.mrb[8].mxu0 }
 0x104   : > { %v498_v32 = vand.u32 2147483647, %v2970_v31  ;;  %v501_v33 = vand.u32 2139095040, %v2970_v31  ;;  %v2974_v34 = vpop.f32.mrb[9].mxu0 }
 0x105   : > { %v602_v35 = vand.u32 2147483647, %v2974_v34  ;;  %v605_v36 = vand.u32 2139095040, %v2974_v34  ;;  %v2978_v37 = vpop.f32.mrb[10].mxu0 }
 0x106   : > { %v502_v38 = vshrl.u32 %v501_v33, 23  ;;  %v505_v39 = vand.u32 8388607, %v498_v32  ;;  %v709_v42 = vand.u32 2139095040, %v2978_v37  ;;  %v2985_v44 = vpop.f32.mrb[11].mxu0 }
 0x107   : > { %v606_v40 = vshrl.u32 %v605_v36, 23  ;;  %v609_v41 = vand.u32 8388607, %v602_v35 }
 0x108   : > { %v2525_v43 = vadd.s32 4294967169, %v502_v38  ;;  %v710_v46 = vshrl.u32 %v709_v42, 23  ;;  %v506_v48 = vor.u32 8388608, %v505_v39 }
 0x109   : > { %v2529_v45 = vadd.s32 4294967169, %v606_v40  ;;  %v610_v49 = vor.u32 8388608, %v609_v41 }
 0x10a   : > { %v508_v47 = vadd.s32 1, %v2525_v43  ;;  %v2533_v51 = vadd.s32 4294967169, %v710_v46  ;;  %v2995_v60 = vshll.u32 %v506_v48, 8 }
 0x10b   : > { %v612_v50 = vadd.s32 1, %v2529_v45  ;;  %v2987_v52 = vpop.f32.mrb[12].mxu0  ;;  %v2997_v61 = vshll.u32 %v610_v49, 8 }
 0x10c   : > { %vm509_vm3 = vcmp.gt.s32.totalorder %v508_v47, 0  ;;  %v2989_v53 = vpop.f32.mrb[13].mxu0  ;;  %v2999_v62 = vadd.s32 1, %v2533_v51 }
 0x10d   : > { %v510_v54 = vsel %vm509_vm3, %v508_v47, 0  ;;  %vm613_vm4 = vcmp.gt.s32.totalorder %v612_v50, 0  ;;  %v2991_v55 = vpop.f32.mrb[14].mxu0 }
 0x10e   : > { %v511_v56 = vshrl.u32 %v510_v54, 5  ;;  %v512_v57 = vand.u32 31, %v510_v54  ;;  %v614_v58 = vsel %vm613_vm4, %v612_v50, 0  ;;  %v2993_v59 = vpop.f32.mrb[15].mxu0  ;;  %vm717_vm9 = vcmp.gt.s32.totalorder %v2999_v62, 0 }
 0x10f   : > { %v3002_v3 = vshrl.u32 %v614_v58, 5  ;;  %v616_v4 = vand.u32 31, %v614_v58 }
 0x110   : > { %v513_v63 = vsub.s32 32, %v512_v57  ;;  %v515_v2 = vshll.u32 %v4660_v1, %v512_v57  ;;  %v518_v6 = vshll.u32 %v4639_v5, %v512_v57  ;;  %v521_v8 = vshll.u32 %v4641_v7, %v512_v57 }
 0x111   : > { %v524_v10 = vshll.u32 %v4643_v9, %v512_v57  ;;  %v527_v12 = vshll.u32 %v4653_v11, %v512_v57  ;;  %vm530_vm5 = vcmp.lt.s32.totalorder %v511_v56, 1  ;;  %vm531_vm6 = vcmp.lt.s32.totalorder %v511_v56, 2 }
 0x112   : > { %v516_v13 = vshrl.u32 %v4639_v5, %v513_v63  ;;  %v519_v14 = vshrl.u32 %v4641_v7, %v513_v63  ;;  %v522_v15 = vshrl.u32 %v4643_v9, %v513_v63  ;;  %v514_v16 = vshrl.u32 %v4660_v1, %v513_v63 }
 0x113   : > { %v525_v17 = vshrl.u32 %v4653_v11, %v513_v63  ;;  %v528_v19 = vshrl.u32 %v4637_v18, %v513_v63  ;;  %v617_v33 = vsub.s32 32, %v616_v4  ;;  %vm532_vm7 = vcmp.lt.s32.totalorder %v511_v56, 3 }
 0x114   : > { %v517_v20 = vor.u32 %v516_v13, %v515_v2  ;;  %v520_v21 = vor.u32 %v519_v14, %v518_v6  ;;  %v523_v22 = vor.u32 %v522_v15, %v521_v8  ;;  %vm533_vm8 = vcmp.lt.s32.totalorder %v511_v56, 4 }
 0x115   : > { %v526_v36 = vor.u32 %v525_v17, %v524_v10  ;;  %v529_v38 = vor.u32 %v528_v19, %v527_v12  ;;  %v619_v47 = vshll.u32 %v4660_v1, %v616_v4  ;;  %v620_v50 = vshrl.u32 %v4639_v5, %v617_v33 }
 0x116   : > { %v534_v39 = vsel %vm530_vm5, %v514_v16, %v517_v20  ;;  %v535_v40 = vsel %vm533_vm8, %v523_v22, 2102212464  ;;  %v538_v41 = vsel %vm530_vm5, %v517_v20, %v520_v21  ;;  %v542_v42 = vsel %vm530_vm5, %v520_v21, %v523_v22 }
 0x117   : > { %v536_v43 = vsel %vm532_vm7, %v520_v21, %v535_v40  ;;  %v539_v45 = vsel %vm533_vm8, %v526_v36, 920167782  ;;  %v543_v46 = vsel %vm533_vm8, %v529_v38, 1326507024  ;;  %v622_v51 = vshll.u32 %v4639_v5, %v616_v4 }
 0x118   : > { %v540_v48 = vsel %vm532_vm7, %v523_v22, %v539_v45  ;;  %v544_v49 = vsel %vm532_vm7, %v526_v36, %v543_v46  ;;  %v537_v54 = vsel %vm531_vm6, %v534_v39, %v536_v43  ;;  %v623_v63 = vshrl.u32 %v4641_v7, %v617_v33 }
 0x119   : > { %v541_v57 = vsel %vm531_vm6, %v538_v41, %v540_v48  ;;  %v545_v58 = vsel %vm531_vm6, %v542_v42, %v544_v49  ;;  %v621_v12 = vor.u32 %v620_v50, %v619_v47  ;;  %v625_v14 = vshll.u32 %v4641_v7, %v616_v4 }
 0x11a   : > { %v3026_v2 = vmul.u32.u64.low %v2995_v60, %v545_v58  ;;  %v3027_v6 = vmul.u32.u64.high %v2995_v60, %v545_v58, %v3026_v2  ;;  %v3030_v8 = vmul.u32.u64.low %v2995_v60, %v541_v57  ;;  %v3031_v10 = vmul.u32.u64.high %v2995_v60, %v541_v57, %v3030_v8 }
 0x11b   : > { %v624_v13 = vor.u32 %v623_v63, %v622_v51  ;;  %v626_v15 = vshrl.u32 %v4643_v9, %v617_v33  ;;  %v618_v56 = vshrl.u32 %v4660_v1, %v617_v33  ;;  %v628_v16 = vshll.u32 %v4643_v9, %v616_v4 }
 0x11c   : > { %v629_v17 = vshrl.u32 %v4653_v11, %v617_v33  ;;  %v632_v19 = vshrl.u32 %v4637_v18, %v617_v33  ;;  %v553_v20 = vmul.u32 %v2995_v60, %v537_v54  ;;  %v631_v22 = vshll.u32 %v4653_v11, %v616_v4 }
 0x11d   : > { %v627_v21 = vor.u32 %v626_v15, %v625_v14  ;;  %vm634_vm10 = vcmp.lt.s32.totalorder %v3002_v3, 1  ;;  %vm555_vm11 = vc.u32 %v3027_v6, %v3030_v8  ;;  %v556_v36 = vadd.s32 1, %v3031_v10 }
 0x11e   : > { %v630_v38 = vor.u32 %v629_v17, %v628_v16  ;;  %vm635_vm12 = vcmp.lt.s32.totalorder %v3002_v3, 2  ;;  %v633_v39 = vor.u32 %v632_v19, %v631_v22  ;;  %vm636_vm13 = vcmp.lt.s32.totalorder %v3002_v3, 3 }
 0x11f   : > { %vm637_vm14 = vcmp.lt.s32.totalorder %v3002_v3, 4  ;;  %v642_v33 = vsel %vm634_vm10, %v621_v12, %v624_v13  ;;  %v557_v60 = vsel %vm555_vm11, %v556_v36, %v3031_v10  ;;  %v646_v41 = vsel %vm634_vm10, %v624_v13, %v627_v21 }
 0x120   : > { %v639_v40 = vsel %vm637_vm14, %v627_v21, 2102212464  ;;  %v643_v4 = vsel %vm637_vm14, %v630_v38, 920167782  ;;  %v558_v42 = vadd.s32 %v557_v60, %v553_v20  ;;  %v638_v43 = vsel %vm634_vm10, %v618_v56, %v621_v12 }
 0x121   : > { %v644_v45 = vsel %vm636_vm13, %v627_v21, %v643_v4  ;;  %v647_v46 = vsel %vm637_vm14, %v633_v39, 1326507024  ;;  %v640_v47 = vsel %vm636_vm13, %v624_v13, %v639_v40  ;;  %v718_v50 = vsel %vm717_vm9, %v2999_v62, 0 }
 0x122   : > { %v645_v48 = vsel %vm635_vm12, %v642_v33, %v644_v45  ;;  %v648_v49 = vsel %vm636_vm13, %v630_v38, %v647_v46  ;;  %v559_v51 = vadd.s32 536870912, %v558_v42  ;;  %v641_v12 = vsel %vm635_vm12, %v638_v43, %v640_v47 }
 0x123   : > { %v649_v54 = vsel %vm635_vm12, %v646_v41, %v648_v49  ;;  %v3058_v57 = vmul.u32.u64.low %v2997_v61, %v645_v48  ;;  %v3059_v58 = vmul.u32.u64.high %v2997_v61, %v645_v48, %v3058_v57  ;;  %v720_v13 = vand.u32 31, %v718_v50 }
 0x124   : > { %v3063_v63 = vmul.u32.u64.low %v2997_v61, %v649_v54  ;;  %v3064_v2 = vmul.u32.u64.high %v2997_v61, %v649_v54, %v3063_v63  ;;  %v3066_v10 = vshrl.u32 %v559_v51, 30  ;;  %v706_v15 = vand.u32 2147483647, %v2978_v37 }
 0x125   : > { %v660_v14 = vadd.s32 1, %v3059_v58  ;;  %v721_v56 = vsub.s32 32, %v720_v13  ;;  %v657_v16 = vmul.u32 %v2997_v61, %v641_v12  ;;  %v813_v17 = vand.u32 2139095040, %v2985_v44 }
 0x126   : > { %v561_v62 = vshll.u32 %v3066_v10, 30  ;;  %vm659_vm15 = vc.u32 %v3064_v2, %v3058_v57  ;;  %v713_v36 = vand.u32 8388607, %v706_v15  ;;  %v719_v33 = vshrl.u32 %v718_v50, 5 }
 0x127   : > { %v661_v3 = vsel %vm659_vm15, %v660_v14, %v3059_v58  ;;  %v724_v21 = vshrl.u32 %v4639_v5, %v721_v56  ;;  %v727_v38 = vshrl.u32 %v4641_v7, %v721_v56  ;;  %v730_v61 = vshrl.u32 %v4643_v9, %v721_v56 }
 0x128   : > { %v3077_v19 = vsub.s32 %v558_v42, %v561_v62  ;;  %v662_v20 = vadd.s32 %v661_v3, %v657_v16  ;;  %v723_v60 = vshll.u32 %v4660_v1, %v720_v13  ;;  %v814_v40 = vshrl.u32 %v813_v17, 23  ;;  %v2169_v16 = vpop.permute.xlu0 %2168 }
 0x129   : > { %v726_v41 = vshll.u32 %v4639_v5, %v720_v13  ;;  %v729_v42 = vshll.u32 %v4641_v7, %v720_v13  ;;  %v733_v43 = vshrl.u32 %v4653_v11, %v721_v56  ;;  %v732_v47 = vshll.u32 %v4643_v9, %v720_v13 }
 0x12a   : > { %v564_v22 = vsub.s32 0, %v3077_v19  ;;  %v663_v39 = vadd.s32 536870912, %v662_v20  ;;  %v725_v46 = vor.u32 %v724_v21, %v723_v60  ;;  %v736_v48 = vshrl.u32 %v4637_v18, %v721_v56 }
 0x12b   : > { %v728_v50 = vor.u32 %v727_v38, %v726_v41  ;;  %v731_v51 = vor.u32 %v730_v61, %v729_v42  ;;  %v735_v54 = vshll.u32 %v4653_v11, %v720_v13  ;;  %v734_v63 = vor.u32 %v733_v43, %v732_v47 }
 0x12c   : > { %v2526_v4 = vmin.u32 %v564_v22, %v3077_v19  ;;  %v3091_v45 = vshrl.u32 %v663_v39, 30  ;;  %v714_v62 = vor.u32 8388608, %v713_v36  ;;  %vm741_vm0 = vcmp.lt.s32.totalorder %v719_v33, 4 }
 0x12d   : > { %v737_v14 = vor.u32 %v736_v48, %v735_v54  ;;  %vm738_vm1 = vcmp.lt.s32.totalorder %v719_v33, 1  ;;  %vm740_vm2 = vcmp.lt.s32.totalorder %v719_v33, 3  ;;  %v747_v3 = vsel %vm741_vm0, %v734_v63, 920167782 }
 0x12e   : > { %v566_v49 = vclz %v2526_v4  ;;  %v665_v58 = vshll.u32 %v3091_v45, 30  ;;  %v746_v21 = vsel %vm738_vm1, %v725_v46, %v728_v50  ;;  %v748_v22 = vsel %vm740_vm2, %v731_v51, %v747_v3 }
 0x12f   : > { %v2537_v13 = vadd.s32 4294967169, %v814_v40  ;;  %vm739_vm4 = vcmp.lt.s32.totalorder %v719_v33, 2  ;;  %v750_v36 = vsel %vm738_vm1, %v728_v50, %v731_v51  ;;  %v722_v39 = vshrl.u32 %v4660_v1, %v721_v56  ;;  %v2174_v56 = vpop.permute.xlu0 %2173 }
 0x130   : > { %v2527_v12 = vadd.s32 4294967294, %v566_v49  ;;  %v3097_v17 = vsub.s32 %v662_v20, %v665_v58  ;;  %v743_v60 = vsel %vm741_vm0, %v731_v51, 2102212464  ;;  %v751_v4 = vsel %vm741_vm0, %v737_v14, 1326507024 }
 0x131   : > { %v749_v42 = vsel %vm739_vm4, %v746_v21, %v748_v22  ;;  %v752_v40 = vsel %vm740_vm2, %v734_v63, %v751_v4  ;;  %v754_v43 = vshll.u32 %v714_v62, 8  ;;  %v3114_v47 = vadd.f32 %v2169_v16, %v2954_v23  ;;  %v2179_v4 = vpop.permute.xlu1 %2178 }
 0x132   : > { %vm2528_vm3 = vcmp.lt.s32.totalorder %v2527_v12, 0  ;;  %v668_v61 = vsub.s32 0, %v3097_v17  ;;  %v742_v48 = vsel %vm738_vm1, %v722_v39, %v725_v46  ;;  %v753_v49 = vsel %vm739_vm4, %v750_v36, %v752_v40 }
 0x133   : > { %v3102_v38 = vsel %vm2528_vm3, 0, %v2527_v12  ;;  %v820_v54 = vadd.s32 1, %v2537_v13  ;;  %v744_v51 = vsel %vm740_vm2, %v728_v50, %v743_v60  ;;  %v584_v21 = vsub.s32 4, %v3066_v10 }
 0x134   : > { %v574_v20 = vsub.s32 4294967266, %v3102_v38  ;;  %v2530_v41 = vmin.u32 %v668_v61, %v3097_v17  ;;  %v3119_v12 = vmul.u32.u64.low %v754_v43, %v753_v49  ;;  %v3120_v14 = vmul.u32.u64.high %v754_v43, %v753_v49, %v3119_v12 }
 0x135   : > { %v3123_v63 = vmul.u32.u64.low %v754_v43, %v749_v42  ;;  %v3124_v62 = vmul.u32.u64.high %v754_v43, %v749_v42, %v3123_v63  ;;  %v3128_v23 = vadd.f32 %v2169_v16, %v2956_v24  ;;  %v810_v22 = vand.u32 2147483647, %v2985_v44 }
 0x136   : > { %v670_v58 = vclz %v2530_v41  ;;  %v575_v3 = vadd.s32 127, %v574_v20  ;;  %vm821_vm5 = vcmp.gt.s32.totalorder %v820_v54, 0  ;;  %v3132_v13 = vadd.f32 %v2174_v56, %v2958_v25 }
 0x137   : > { %v570_v50 = vsub.s32 32, %v3102_v38  ;;  %v745_v61 = vsel %vm739_vm4, %v742_v48, %v744_v51  ;;  %v822_v36 = vsel %vm821_vm5, %v820_v54, 0  ;;  %vm500_vm6 = vcmp.lt.s32.totalorder %v2970_v31, 0 }
 0x138   : > { %v2531_v46 = vadd.s32 4294967294, %v670_v58  ;;  %v554_v20 = vadd.s32 %v3030_v8, %v3027_v6  ;;  %vm763_vm8 = vc.u32 %v3120_v14, %v3123_v63  ;;  %v576_v24 = vshll.u32 %v575_v3, 23 }
 0x139   : > { %v585_v25 = vsel %vm500_vm6, %v584_v21, %v3066_v10  ;;  %v764_v16 = vadd.s32 1, %v3124_v62  ;;  %v824_v39 = vand.u32 31, %v822_v36  ;;  %v3146_v33 = vadd.f32 %v2174_v56, %v2960_v26 }
 0x13a   : > { %vm2532_vm7 = vcmp.lt.s32.totalorder %v2531_v46, 0  ;;  %vm3150_vm9 = vcmp.le.f32.partialorder %v498_v32, 0.7853982  ;;  %v761_v6 = vmul.u32 %v754_v43, %v745_v61  ;;  %v817_v8 = vand.u32 8388607, %v810_v22 }
 0x13b   : > { %v572_v41 = vshrl.u32 %v554_v20, %v570_v50  ;;  %v3156_v42 = vsel %vm2532_vm7, 0, %v2531_v46  ;;  %v688_v10 = vsub.s32 4, %v3091_v45  ;;  %v765_v40 = vsel %vm763_vm8, %v764_v16, %v3124_v62 }
 0x13c   : > { %v3161_v26 = vadd.f32 %v2179_v4, %v2962_v27  ;;  %v587_v32 = vsel %vm3150_vm9, 0, %v585_v25  ;;  %v766_v48 = vadd.s32 %v765_v40, %v761_v6  ;;  %v825_v49 = vsub.s32 32, %v824_v39 }
 0x13d   : > { %v3166_v43 = vadd.f32 %v2179_v4, %v2964_v28  ;;  %v571_v54 = vshll.u32 %v3077_v19, %v3102_v38  ;;  %v577_v56 = vor.u32 4788187, %v576_v24  ;;  %vm604_vm10 = vcmp.lt.s32.totalorder %v2974_v34, 0 }
 0x13e   : > { %vm3173_vm11 = vcmp.le.f32.partialorder %v602_v35, 0.7853982  ;;  %v678_v27 = vsub.s32 4294967266, %v3156_v42  ;;  %v767_v51 = vadd.s32 536870912, %v766_v48  ;;  %v818_v12 = vor.u32 8388608, %v817_v8 }
 0x13f   : > { %v573_v3 = vor.u32 %v572_v41, %v571_v54  ;;  %v3178_v21 = vadd.s32 3, %v587_v32  ;;  %v658_v28 = vadd.s32 %v3058_v57, %v3064_v2  ;;  %v3185_v19 = vsel %vm604_vm10, %v688_v10, %v3091_v45 }
 0x140   : > { %v3187_v38 = vshrl.u32 %v767_v51, 30  ;;  %v3189_v35 = vshrl.u32 %v822_v36, 5  ;;  %v828_v62 = vshrl.u32 %v4639_v5, %v825_v49  ;;  %v831_v46 = vshrl.u32 %v4641_v7, %v825_v49 }
 0x141   : > { %v578_v50 = vand.u32 2147483647, %v577_v56  ;;  %v834_v61 = vshrl.u32 %v4643_v9, %v825_v49  ;;  %v836_v20 = vshll.u32 %v4643_v9, %v824_v39  ;;  %v837_v57 = vshrl.u32 %v4653_v11, %v825_v49 }
 0x142   : > { %v679_v2 = vadd.s32 127, %v678_v27  ;;  %v769_v24 = vshll.u32 %v3187_v38, 30  ;;  %v827_v45 = vshll.u32 %v4660_v1, %v824_v39  ;;  %v830_v25 = vshll.u32 %v4639_v5, %v824_v39 }
 0x143   : > { %v833_v36 = vshll.u32 %v4641_v7, %v824_v39  ;;  %v838_v16 = vor.u32 %v837_v57, %v836_v20  ;;  %v839_v6 = vshll.u32 %v4653_v11, %v824_v39  ;;  %v840_v8 = vshrl.u32 %v4637_v18, %v825_v49 }
 0x144   : > { %v674_v4 = vsub.s32 32, %v3156_v42  ;;  %v3203_v41 = vsub.s32 %v766_v48, %v769_v24  ;;  %v829_v10 = vor.u32 %v828_v62, %v827_v45  ;;  %v832_v40 = vor.u32 %v831_v46, %v830_v25 }
 0x145   : > { %v580_v32 = vcvt.s32.f32 %v573_v3  ;;  %v691_v54 = vsel %vm3173_vm11, 0, %v3185_v19  ;;  %v835_v56 = vor.u32 %v834_v61, %v833_v36  ;;  %v841_v27 = vor.u32 %v840_v8, %v839_v6 }
 0x146   : > { %v772_v51 = vsub.s32 0, %v3203_v41  ;;  %vm845_vm12 = vcmp.lt.s32.totalorder %v3189_v35, 4  ;;  %v858_v39 = vshll.u32 %v818_v12, 8  ;;  %v917_v20 = vand.u32 2139095040, %v2987_v52 }
 0x147   : > { %v581_v57 = vmul.f32 %v580_v32, %v578_v50  ;;  %v680_v0 = vshll.u32 %v679_v2, 23  ;;  %vm842_vm13 = vcmp.lt.s32.totalorder %v3189_v35, 1  ;;  %v851_v48 = vsel %vm845_vm12, %v838_v16, 920167782 }
 0x148   : > { %v676_v3 = vshrl.u32 %v658_v28, %v674_v4  ;;  %v2534_v62 = vmin.u32 %v772_v51, %v3203_v41  ;;  %vm844_vm14 = vcmp.lt.s32.totalorder %v3189_v35, 3  ;;  %v850_v46 = vsel %vm842_vm13, %v829_v10, %v832_v40 }
 0x149   : > { %v675_v12 = vshll.u32 %v3097_v17, %v3156_v42  ;;  %v852_v50 = vsel %vm844_vm14, %v835_v56, %v851_v48  ;;  %v854_v61 = vsel %vm842_vm13, %v832_v40, %v835_v56  ;;  %v855_v2 = vsel %vm845_vm12, %v841_v27, 1326507024 }
 0x14a   : > { %vm708_vm15 = vcmp.lt.s32.totalorder %v2978_v37, 0  ;;  %v774_v28 = vclz %v2534_v62  ;;  %v826_v24 = vshrl.u32 %v4660_v1, %v825_v49  ;;  %vm843_vm0 = vcmp.lt.s32.totalorder %v3189_v35, 2 }
 0x14b   : > { %v847_v45 = vsel %vm845_vm12, %v835_v56, 2102212464  ;;  %v582_v17 = vxor.u32 2147483648, %v581_v57  ;;  %v681_v42 = vor.u32 4788187, %v680_v0  ;;  %v853_v25 = vsel %vm843_vm0, %v850_v46, %v852_v50 }
 0x14c   : > { %v856_v36 = vsel %vm844_vm14, %v838_v16, %v855_v2  ;;  %v677_v6 = vor.u32 %v676_v3, %v675_v12  ;;  %v2535_v8 = vadd.s32 4294967294, %v774_v28  ;;  %v846_v4 = vsel %vm842_vm13, %v826_v24, %v829_v10 }
 0x14d   : > { %v857_v49 = vsel %vm843_vm0, %v854_v61, %v856_v36  ;;  %v848_v32 = vsel %vm844_vm14, %v832_v40, %v847_v45  ;;  %v918_v0 = vshrl.u32 %v917_v20, 23  ;;  %v762_v51 = vadd.s32 %v3123_v63, %v3120_v14 }
 0x14e   : > { %v3241_v56 = vmul.u32.u64.low %v858_v39, %v857_v49  ;;  %v3242_v27 = vmul.u32.u64.high %v858_v39, %v857_v49, %v3241_v56  ;;  %vm2536_vm1 = vcmp.lt.s32.totalorder %v2535_v8, 0  ;;  %v682_v3 = vand.u32 2147483647, %v681_v42 }
 0x14f   : > { %v3246_v16 = vmul.u32.u64.low %v858_v39, %v853_v25  ;;  %v3247_v48 = vmul.u32.u64.high %v858_v39, %v853_v25, %v3246_v16  ;;  %v777_v10 = vsel %vm2536_vm1, 0, %v2535_v8  ;;  %v792_v62 = vsub.s32 4, %v3187_v38 }
 0x150   : > { %v2541_v46 = vadd.s32 4294967169, %v918_v0  ;;  %v583_v40 = vsel %vm500_vm6, %v582_v17, %v581_v57  ;;  %v778_v12 = vsub.s32 32, %v777_v10  ;;  %v782_v50 = vsub.s32 4294967266, %v777_v10 }
 0x151   : > { %v849_v20 = vsel %vm843_vm0, %v846_v4, %v848_v32  ;;  %v684_v61 = vcvt.s32.f32 %v677_v6  ;;  %v779_v14 = vshll.u32 %v3203_v41, %v777_v10  ;;  %vm867_vm2 = vc.u32 %v3242_v27, %v3246_v16 }
 0x152   : > { %v4634_v63 = vand.u32 2147483647, %v2987_v52  ;;  %v780_v2 = vshrl.u32 %v762_v51, %v778_v12  ;;  %v783_v28 = vadd.s32 127, %v782_v50  ;;  %v868_v24 = vadd.s32 1, %v3247_v48 }
 0x153   : > { %v924_v45 = vadd.s32 1, %v2541_v46  ;;  %v586_v57 = vsel %vm3150_vm9, %v2970_v31, %v583_v40  ;;  %v3263_v17 = vmul.f32 %v684_v61, %v682_v3  ;;  %v793_v35 = vsel %vm708_vm15, %v792_v62, %v3187_v38 }
 0x154   : > { %v865_v41 = vmul.u32 %v858_v39, %v849_v20  ;;  %v781_v42 = vor.u32 %v780_v2, %v779_v14  ;;  %v784_v25 = vshll.u32 %v783_v28, 23  ;;  %v869_v36 = vsel %vm867_vm2, %v868_v24, %v3247_v48 }
 0x155   : > { %vm925_vm3 = vcmp.gt.s32.totalorder %v924_v45, 0  ;;  %vm3271_vm4 = vcmp.le.f32.partialorder %v706_v15, 0.7853982  ;;  %v921_v8 = vand.u32 8388607, %v4634_v63  ;;  %2726 = vcosq.f32 %v586_v57 }
 0x156   : > { %v870_v60 = vadd.s32 %v869_v36, %v865_v41  ;;  %v926_v4 = vsel %vm925_vm3, %v924_v45, 0  ;;  %v3278_v38 = vand.u32 3, %v3178_v21  ;;  %v785_v39 = vor.u32 4788187, %v784_v25 }
 0x157   : > { %v928_v49 = vand.u32 31, %v926_v4  ;;  %2728 = vsinq.f32 %v586_v57  ;;  %v3284_v15 = vadd.s32 3, %v691_v54  ;;  %v795_v32 = vsel %vm3271_vm4, 0, %v793_v35 }
 0x158   : > { %v871_v56 = vadd.s32 536870912, %v870_v60  ;;  %v686_v0 = vxor.u32 2147483648, %v3263_v17  ;;  %v786_v51 = vand.u32 2147483647, %v785_v39  ;;  %v788_v48 = vcvt.s32.f32 %v781_v42 }
 0x159   : > { %v929_v3 = vsub.s32 32, %v928_v49  ;;  %v922_v10 = vor.u32 8388608, %v921_v8  ;;  %v3291_v62 = vshrl.u32 %v926_v4, 5  ;;  %v1021_v46 = vand.u32 2139095040, %v2989_v53 }
 0x15a   : > { %v3289_v21 = vshrl.u32 %v871_v56, 30  ;;  %v789_v40 = vmul.f32 %v788_v48, %v786_v51  ;;  %v931_v19 = vshll.u32 %v4660_v1, %v928_v49  ;;  %v937_v20 = vshll.u32 %v4641_v7, %v928_v49 }
 0x15b   : > { %v932_v54 = vshrl.u32 %v4639_v5, %v929_v3  ;;  %v935_v12 = vshrl.u32 %v4641_v7, %v929_v3  ;;  %v938_v61 = vshrl.u32 %v4643_v9, %v929_v3  ;;  %v941_v14 = vshrl.u32 %v4653_v11, %v929_v3 }
 0x15c   : > { %v873_v50 = vshll.u32 %v3289_v21, 30  ;;  %v790_v2 = vxor.u32 2147483648, %v789_v40  ;;  %v934_v28 = vshll.u32 %v4639_v5, %v928_v49  ;;  %v940_v24 = vshll.u32 %v4643_v9, %v928_v49 }
 0x15d   : > { %v944_v45 = vshrl.u32 %v4637_v18, %v929_v3  ;;  %v3304_v57 = vadd.s32 3, %v795_v32  ;;  %v939_v41 = vor.u32 %v938_v61, %v937_v20  ;;  %v943_v42 = vshll.u32 %v4653_v11, %v928_v49 }
 0x15e   : > { %v3306_v35 = vsub.s32 %v870_v60, %v873_v50  ;;  %v933_v25 = vor.u32 %v932_v54, %v931_v19  ;;  %v936_v36 = vor.u32 %v935_v12, %v934_v28  ;;  %v942_v8 = vor.u32 %v941_v14, %v940_v24 }
 0x15f   : > { %v962_v4 = vshll.u32 %v922_v10, 8  ;;  %v945_v56 = vor.u32 %v944_v45, %v943_v42  ;;  %v4636_v51 = vand.u32 2147483647, %v2989_v53  ;;  %v1022_v48 = vshrl.u32 %v1021_v46, 23  ;;  %v2727_v63 = vpop.eup %2726 }
 0x160   : > { %v876_v39 = vsub.s32 0, %v3306_v35  ;;  %v791_v32 = vsel %vm708_vm15, %v790_v2, %v789_v40  ;;  %vm812_vm5 = vcmp.lt.s32.totalorder %v2985_v44, 0  ;;  %v896_v60 = vsub.s32 4, %v3289_v21 }
 0x161   : > { %v930_v49 = vshrl.u32 %v4660_v1, %v929_v3  ;;  %vm949_vm6 = vcmp.lt.s32.totalorder %v3291_v62, 4  ;;  %v2729_v19 = vpop.eup %2728  ;;  %vm946_vm7 = vcmp.lt.s32.totalorder %v3291_v62, 1  ;;  %vm947_vm8 = vcmp.lt.s32.totalorder %v3291_v62, 2 }
 0x162   : > { %v2538_v10 = vmin.u32 %v876_v39, %v3306_v35  ;;  %v951_v46 = vsel %vm949_vm6, %v939_v41, 2102212464  ;;  %vm597_vm9 = vcmp.eq.s32.totalorder %v3278_v38, 2  ;;  %vm948_vm12 = vcmp.lt.s32.totalorder %v3291_v62, 3 }
 0x163   : > { %v954_v40 = vsel %vm946_vm7, %v933_v25, %v936_v36  ;;  %v955_v54 = vsel %vm949_vm6, %v942_v8, 920167782  ;;  %v958_v12 = vsel %vm946_vm7, %v936_v36, %v939_v41  ;;  %vm594_vm13 = vcmp.eq.s32.totalorder %v3278_v38, 0 }
 0x164   : > { %v878_v3 = vclz %v2538_v10  ;;  %v950_v50 = vsel %vm946_vm7, %v930_v49, %v933_v25  ;;  %v956_v20 = vsel %vm948_vm12, %v939_v41, %v955_v54  ;;  %v959_v61 = vsel %vm949_vm6, %v945_v56, 1326507024 }
 0x165   : > { %vm3325_vm14 = vcmp.le.f32.partialorder %v810_v22, 0.7853982  ;;  %v952_v2 = vsel %vm948_vm12, %v936_v36, %v951_v46  ;;  %v957_v28 = vsel %vm947_vm8, %v954_v40, %v956_v20  ;;  %v960_v24 = vsel %vm948_vm12, %v942_v8, %v959_v61 }
 0x166   : > { %v2545_v45 = vadd.s32 4294967169, %v1022_v48  ;;  %v2539_v42 = vadd.s32 4294967294, %v878_v3  ;;  %v961_v39 = vsel %vm947_vm8, %v958_v12, %v960_v24  ;;  %vm593_vm15 = vcmp.lt.s32.totalorder %v3278_v38, 2 }
 0x167   : > { %v3333_v10 = vmul.u32.u64.low %v962_v4, %v957_v28  ;;  %v3334_v25 = vmul.u32.u64.high %v962_v4, %v957_v28, %v3333_v10  ;;  %v687_v22 = vsel %vm604_vm10, %v686_v0, %v3263_v17  ;;  %v598_v56 = vxor.u32 2147483648, %v2727_v63 }
 0x168   : > { %v3343_v41 = vmul.u32.u64.low %v962_v4, %v961_v39  ;;  %v3344_v36 = vmul.u32.u64.high %v962_v4, %v961_v39, %v3343_v41  ;;  %v1028_v8 = vadd.s32 1, %v2545_v45  ;;  %v794_v48 = vsel %vm3271_vm4, %v2978_v37, %v791_v32 }
 0x169   : > { %vm2540_vm0 = vcmp.lt.s32.totalorder %v2539_v42, 0  ;;  %v953_v49 = vsel %vm947_vm8, %v950_v50, %v952_v2  ;;  %v595_v46 = vxor.u32 2147483648, %v2729_v19  ;;  %v1025_v54 = vand.u32 8388607, %v4636_v51 }
 0x16a   : > { %v881_v40 = vsel %vm2540_vm0, 0, %v2539_v42  ;;  %vm1029_vm1 = vcmp.gt.s32.totalorder %v1028_v8, 0  ;;  %v690_v17 = vsel %vm3173_vm11, %v2974_v34, %v687_v22  ;;  %v897_v6 = vsel %vm812_vm5, %v896_v60, %v3289_v21 }
 0x16b   : > { %v886_v0 = vsub.s32 4294967266, %v881_v40  ;;  %v972_v32 = vadd.s32 1, %v3334_v25  ;;  %2730 = vcosq.f32 %v794_v48  ;;  %v969_v62 = vmul.u32 %v962_v4, %v953_v49 }
 0x16c   : > { %vm971_vm10 = vc.u32 %v3344_v36, %v3333_v10  ;;  %v1030_v12 = vsel %vm1029_vm1, %v1028_v8, 0  ;;  %v599_v3 = vsel %vm597_vm9, %v598_v56, %v2729_v19  ;;  %v3365_v50 = vand.u32 3, %v3284_v15 }
 0x16d   : > { %v887_v58 = vadd.s32 127, %v886_v0  ;;  %v973_v20 = vsel %vm971_vm10, %v972_v32, %v3334_v25  ;;  %v596_v21 = vsel %vm594_vm13, %v2727_v63, %v595_v46  ;;  %v1026_v61 = vor.u32 8388608, %v1025_v54 }
 0x16e   : > { %v974_v60 = vadd.s32 %v973_v20, %v969_v62  ;;  %v1032_v2 = vand.u32 31, %v1030_v12  ;;  %2732 = vcosq.f32 %v690_v17  ;;  %v3371_v4 = vand.u32 3, %v3304_v57 }
 0x16f   : > { %v882_v28 = vsub.s32 32, %v881_v40  ;;  %v899_v19 = vsel %vm3325_vm14, 0, %v897_v6  ;;  %2734 = vsinq.f32 %v690_v17  ;;  %v1125_v45 = vand.u32 2139095040, %v2991_v55 }
 0x170   : > { %v975_v15 = vadd.s32 536870912, %v974_v60  ;;  %v1033_v24 = vsub.s32 32, %v1032_v2  ;;  %v3378_v42 = vsel %vm593_vm15, %v596_v21, %v599_v3  ;;  %v866_v63 = vadd.s32 %v3246_v16, %v3242_v27 }
 0x171   : > { %v888_v39 = vshll.u32 %v887_v58, 23  ;;  %v4635_v57 = vand.u32 2147483647, %v2991_v55  ;;  %2736 = vsinq.f32 %v794_v48  ;;  %v3383_v25 = vadd.s32 3, %v899_v19 }
 0x172   : > { %v3385_v22 = vshrl.u32 %v975_v15, 30  ;;  %v3387_v41 = vshll.u32 %v1026_v61, 8  ;;  %v883_v8 = vshll.u32 %v3306_v35, %v881_v40  ;;  %v884_v56 = vshrl.u32 %v866_v63, %v882_v28 }
 0x173   : > { %v1036_v38 = vshrl.u32 %v4639_v5, %v1033_v24  ;;  %v1039_v49 = vshrl.u32 %v4641_v7, %v1033_v24  ;;  %v1035_v27 = vshll.u32 %v4660_v1, %v1032_v2  ;;  %v1042_v16 = vshrl.u32 %v4643_v9, %v1033_v24 }
 0x174   : > { %v977_v46 = vshll.u32 %v3385_v22, 30  ;;  %v1126_v48 = vshrl.u32 %v1125_v45, 23  ;;  %v889_v54 = vor.u32 4788187, %v888_v39  ;;  %v1038_v17 = vshll.u32 %v4639_v5, %v1032_v2 }
 0x175   : > { %v1044_v0 = vshll.u32 %v4643_v9, %v1032_v2  ;;  %v1045_v6 = vshrl.u32 %v4653_v11, %v1033_v24  ;;  %v3398_v35 = vpop.eup %2730  ;;  %v1031_v32 = vshrl.u32 %v1030_v12, 5  ;;  %v1041_v62 = vshll.u32 %v4641_v7, %v1032_v2 }
 0x176   : > { %v3400_v40 = vsub.s32 %v974_v60, %v977_v46  ;;  %v1048_v3 = vshrl.u32 %v4637_v18, %v1033_v24  ;;  %v885_v58 = vor.u32 %v884_v56, %v883_v8  ;;  %v1037_v20 = vor.u32 %v1036_v38, %v1035_v27 }
 0x177   : > { %v1040_v21 = vor.u32 %v1039_v49, %v1038_v17  ;;  %v1046_v61 = vor.u32 %v1045_v6, %v1044_v0  ;;  %vm916_vm11 = vcmp.lt.s32.totalorder %v2987_v52, 0  ;;  %v1043_v19 = vor.u32 %v1042_v16, %v1041_v62 }
 0x178   : > { %v980_v28 = vsub.s32 0, %v3400_v40  ;;  %v1047_v15 = vshll.u32 %v4653_v11, %v1032_v2  ;;  %v3409_v60 = vand.u32 8388607, %v4635_v57  ;;  %v3411_v12 = vpop.eup %2732  ;;  %v806_v45 = vxor.u32 2147483648, %v3398_v35 }
 0x179   : > { %v890_v63 = vand.u32 2147483647, %v889_v54  ;;  %v970_v39 = vadd.s32 %v3333_v10, %v3344_v36  ;;  %v2549_v8 = vadd.s32 4294967169, %v1126_v48  ;;  %v3416_v56 = vpop.eup %2734  ;;  %vm805_vm2 = vcmp.eq.s32.totalorder %v3371_v4, 2 }
 0x17a   : > { %v2542_v38 = vmin.u32 %v980_v28, %v3400_v40  ;;  %v1049_v2 = vor.u32 %v1048_v3, %v1047_v15  ;;  %vm1050_vm3 = vcmp.lt.s32.totalorder %v1031_v32, 1  ;;  %vm1053_vm4 = vcmp.lt.s32.totalorder %v1031_v32, 4 }
 0x17b   : > { %v892_v49 = vcvt.s32.f32 %v885_v58  ;;  %v1034_v46 = vshrl.u32 %v4660_v1, %v1033_v24  ;;  %v1058_v27 = vsel %vm1050_vm3, %v1037_v20, %v1040_v21  ;;  %v1059_v16 = vsel %vm1053_vm4, %v1046_v61, 920167782  ;;  %v2737_v54 = vpop.eup %2736 }
 0x17c   : > { %vm802_vm6 = vcmp.eq.s32.totalorder %v3371_v4, 0  ;;  %v4673_v10 = vand.u32 2147483647, %v2987_v52  ;;  %v982_v48 = vclz %v2542_v38  ;;  %v1000_v17 = vsub.s32 4, %v3385_v22 }
 0x17d   : > { %vm1052_vm8 = vcmp.lt.s32.totalorder %v1031_v32, 3  ;;  %v1055_v0 = vsel %vm1053_vm4, %v1043_v19, 2102212464  ;;  %v893_v24 = vmul.f32 %v892_v49, %v890_v63  ;;  %vm1051_vm9 = vcmp.lt.s32.totalorder %v1031_v32, 2 }
 0x17e   : > { %vm3426_vm7 = vcmp.le.f32.partialorder %v4673_v10, 0.7853982  ;;  %v1060_v6 = vsel %vm1052_vm8, %v1043_v19, %v1059_v16  ;;  %v1062_v62 = vsel %vm1050_vm3, %v1040_v21, %v1043_v19  ;;  %v2543_v3 = vadd.s32 4294967294, %v982_v48  ;;  %v3436_v10 = vpop.f32.mrb[16].mxu0 }
 0x17f   : > { %v1054_v58 = vsel %vm1050_vm3, %v1034_v46, %v1037_v20  ;;  %v1061_v28 = vsel %vm1051_vm9, %v1058_v27, %v1060_v6  ;;  %v1063_v15 = vsel %vm1053_vm4, %v1049_v2, 1326507024  ;;  %v1056_v38 = vsel %vm1052_vm8, %v1040_v21, %v1055_v0 }
 0x180   : > { %v1064_v57 = vsel %vm1052_vm8, %v1046_v61, %v1063_v15  ;;  %v3439_v51 = vmul.u32.u64.low %v3387_v41, %v1061_v28  ;;  %v3440_v18 = vmul.u32.u64.high %v3387_v41, %v1061_v28, %v3439_v51  ;;  %v803_v63 = vxor.u32 2147483648, %v2737_v54 }
 0x181   : > { %vm2544_vm12 = vcmp.lt.s32.totalorder %v2543_v3, 0  ;;  %v1065_v19 = vsel %vm1051_vm9, %v1062_v62, %v1064_v57  ;;  %v1132_v49 = vadd.s32 1, %v2549_v8  ;;  %v3447_v20 = vsel %vm916_vm11, %v1000_v17, %v3385_v22 }
 0x182   : > { %v985_v16 = vsel %vm2544_vm12, 0, %v2543_v3  ;;  %v3450_v2 = vmul.u32.u64.low %v3387_v41, %v1065_v19  ;;  %v3451_v21 = vmul.u32.u64.high %v3387_v41, %v1065_v19, %v3450_v2  ;;  %v1057_v27 = vsel %vm1051_vm9, %v1054_v58, %v1056_v38  ;;  %v3460_v3 = vpop.f32.mrb[17].mxu0 }
 0x183   : > { %v986_v61 = vsub.s32 32, %v985_v16  ;;  %v990_v46 = vsub.s32 4294967266, %v985_v16  ;;  %vm1133_vm13 = vcmp.gt.s32.totalorder %v1132_v49, 0  ;;  %v3456_v48 = vsel %vm805_vm2, %v806_v45, %v2737_v54 }
 0x184   : > { %v894_v57 = vxor.u32 2147483648, %v893_v24  ;;  %v1076_v8 = vadd.s32 1, %v3440_v18  ;;  %v1134_v0 = vsel %vm1133_vm13, %v1132_v49, 0  ;;  %v987_v22 = vshll.u32 %v3400_v40, %v985_v16 }
 0x185   : > { %v988_v17 = vshrl.u32 %v970_v39, %v986_v61  ;;  %v991_v6 = vadd.s32 127, %v990_v46  ;;  %v1136_v62 = vand.u32 31, %v1134_v0  ;;  %v3465_v32 = vsel %vm802_vm6, %v3398_v35, %v803_v63 }
 0x186   : > { %v1073_v54 = vmul.u32 %v3387_v41, %v1057_v27  ;;  %vm1075_vm15 = vc.u32 %v3451_v21, %v3439_v51  ;;  %v3476_v15 = vsel %vm812_vm5, %v894_v57, %v893_v24  ;;  %v1130_v38 = vor.u32 8388608, %v3409_v60 }
 0x187   : > { %v989_v40 = vor.u32 %v988_v17, %v987_v22  ;;  %v992_v39 = vshll.u32 %v991_v6, 23  ;;  %v1077_v58 = vsel %vm1075_vm15, %v1076_v8, %v3440_v18  ;;  %v1137_v28 = vsub.s32 32, %v1136_v62 }
 0x188   : > { %v1078_v35 = vadd.s32 %v1077_v58, %v1073_v54  ;;  %v3479_v63 = vshrl.u32 %v1134_v0, 5  ;;  %v1139_v41 = vshll.u32 %v4660_v1, %v1136_v62  ;;  %v1142_v16 = vshll.u32 %v4639_v5, %v1136_v62 }
 0x189   : > { %v993_v19 = vor.u32 4788187, %v992_v39  ;;  %v1140_v49 = vshrl.u32 %v4639_v5, %v1137_v28  ;;  %vm1020_vm0 = vcmp.lt.s32.totalorder %v2989_v53, 0  ;;  %v1143_v2 = vshrl.u32 %v4641_v7, %v1137_v28 }
 0x18a   : > { %v1079_v18 = vadd.s32 536870912, %v1078_v35  ;;  %v1145_v24 = vshll.u32 %v4641_v7, %v1136_v62  ;;  %v1146_v61 = vshrl.u32 %v4643_v9, %v1137_v28  ;;  %v996_v60 = vcvt.s32.f32 %v989_v40 }
 0x18b   : > { %v994_v46 = vand.u32 2147483647, %v993_v19  ;;  %v1148_v27 = vshll.u32 %v4643_v9, %v1136_v62  ;;  %v1149_v57 = vshrl.u32 %v4653_v11, %v1137_v28  ;;  %v1141_v0 = vor.u32 %v1140_v49, %v1139_v41 }
 0x18c   : > { %v1080_v8 = vshrl.u32 %v1079_v18, 30  ;;  %v1144_v22 = vor.u32 %v1143_v2, %v1142_v16  ;;  %v4676_v17 = vmov 1326507024   ;;  %v1147_v39 = vor.u32 %v1146_v61, %v1145_v24 }
 0x18d   : > { %v1152_v6 = vshrl.u32 %v4676_v17, %v1137_v28  ;;  %v997_v54 = vmul.f32 %v996_v60, %v994_v46  ;;  %v1150_v58 = vor.u32 %v1149_v57, %v1148_v27  ;;  %v1151_v5 = vshll.u32 %v4653_v11, %v1136_v62 }
 0x18e   : > { %vm590_vm5 = vweird.f32 %v2970_v31  ;;  %v1081_v7 = vshll.u32 %v1080_v8, 30  ;;  %v1138_v19 = vshrl.u32 %v4660_v1, %v1137_v28  ;;  %vm1154_vm1 = vcmp.lt.s32.totalorder %v3479_v63, 1 }
 0x18f   : > { %v1170_v40 = vshll.u32 %v1130_v38, 8  ;;  %v998_v9 = vxor.u32 2147483648, %v997_v54  ;;  %v1104_v45 = vsub.s32 4, %v1080_v8  ;;  %v1153_v18 = vor.u32 %v1152_v6, %v1151_v5 }
 0x190   : > { %vm1157_vm10 = vcmp.lt.s32.totalorder %v3479_v63, 4  ;;  %vm801_vm2 = vcmp.lt.s32.totalorder %v3371_v4, 2  ;;  %v3497_v41 = vsub.s32 %v1078_v35, %v1081_v7  ;;  %vm1156_vm3 = vcmp.lt.s32.totalorder %v3479_v63, 3 }
 0x191   : > { %v1162_v62 = vsel %vm1154_vm1, %v1141_v0, %v1144_v22  ;;  %v1163_v28 = vsel %vm1157_vm10, %v1150_v58, 920167782  ;;  %v999_v38 = vsel %vm916_vm11, %v998_v9, %v997_v54  ;;  %v1159_v5 = vsel %vm1157_vm10, %v1147_v39, 2102212464 }
 0x192   : > { %v1164_v49 = vsel %vm1156_vm3, %v1147_v39, %v1163_v28  ;;  %v1229_v7 = vand.u32 2139095040, %v2993_v59  ;;  %v1002_v35 = vsel %vm3426_vm7, %v2987_v52, %v999_v38  ;;  %v1084_v16 = vsub.s32 0, %v3497_v41  ;;  %v3552_v38 = vpop.f32.mrb[18].mxu0 }
 0x193   : > { %vm1155_vm4 = vcmp.lt.s32.totalorder %v3479_v63, 2  ;;  %v1158_v2 = vsel %vm1154_vm1, %v1138_v19, %v1141_v0  ;;  %v1105_v9 = vsel %vm1020_vm0, %v1104_v45, %v1080_v8  ;;  %v1166_v61 = vsel %vm1154_vm1, %v1144_v22, %v1147_v39 }
 0x194   : > { %v1165_v24 = vsel %vm1155_vm4, %v1162_v62, %v1164_v49  ;;  %v1167_v46 = vsel %vm1157_vm10, %v1153_v18, 1326507024  ;;  %vm798_vm11 = vweird.f32 %v2978_v37  ;;  %2738 = vcosq.f32 %v1002_v35 }
 0x195   : > { %v2546_v60 = vmin.u32 %v1084_v16, %v3497_v41  ;;  %v1160_v27 = vsel %vm1156_vm3, %v1144_v22, %v1159_v5  ;;  %v1168_v45 = vsel %vm1156_vm3, %v1150_v58, %v1167_v46  ;;  %2740 = vsinq.f32 %v1002_v35 }
 0x196   : > { %v1169_v57 = vsel %vm1155_vm4, %v1166_v61, %v1168_v45  ;;  %v3534_v8 = vmul.u32.u64.low %v1170_v40, %v1165_v24  ;;  %v3535_v0 = vmul.u32.u64.high %v1170_v40, %v1165_v24, %v3534_v8  ;;  %v1230_v19 = vshrl.u32 %v1229_v7, 23 }
 0x197   : > { %v1086_v6 = vclz %v2546_v60  ;;  %v3537_v54 = vmul.u32.u64.low %v1170_v40, %v1169_v57  ;;  %v3538_v39 = vmul.u32.u64.high %v1170_v40, %v1169_v57, %v3537_v54  ;;  %v3543_v18 = vsel %vm590_vm5, nan, %v3378_v42 }
 0x198   : > { %v4677_v22 = vsel %vm3426_vm7, 0, %v3447_v20  ;;  %v1161_v62 = vsel %vm1155_vm4, %v1158_v2, %v1160_v27  ;;  %v4645_v28 = vand.u32 2147483647, %v2993_v59  ;;  %v3555_v5 = vand.u32 3, %v3383_v25 }
 0x199   : > { %v1007_v58 = vadd.s32 3, %v4677_v22  ;;  %v4678_v49 = vand.u32 2147483647, %v2989_v53  ;;  %v2547_v42 = vadd.s32 4294967294, %v1086_v6  ;;  %v2553_v36 = vadd.s32 4294967169, %v1230_v19 }
 0x19a   : > { %v808_v20 = vsel %vm801_vm2, %v3465_v32, %v3456_v48  ;;  %v898_v63 = vsel %vm3325_vm14, %v2985_v44, %v3476_v15  ;;  %v1180_v7 = vadd.s32 1, %v3535_v0  ;;  %v1177_v35 = vmul.u32 %v1170_v40, %v1161_v62 }
 0x19b   : > { %vm3559_vm6 = vcmp.le.f32.partialorder %v4678_v49, 0.7853982  ;;  %vm2548_vm7 = vcmp.lt.s32.totalorder %v2547_v42, 0  ;;  %vm1179_vm8 = vc.u32 %v3538_v39, %v3534_v8  ;;  %v1236_v16 = vadd.s32 1, %v2553_v36 }
 0x19c   : > { %v1107_v25 = vsel %vm3559_vm6, 0, %v1105_v9  ;;  %v3575_v2 = vand.u32 3, %v1007_v58  ;;  %v1089_v24 = vsel %vm2548_vm7, 0, %v2547_v42  ;;  %v1181_v4 = vsel %vm1179_vm8, %v1180_v7, %v3535_v0 }
 0x19d   : > { %v1233_v48 = vand.u32 8388607, %v4645_v28  ;;  %v1074_v14 = vadd.s32 %v3439_v51, %v3451_v21  ;;  %v1090_v32 = vsub.s32 32, %v1089_v24  ;;  %v1094_v15 = vsub.s32 4294967266, %v1089_v24 }
 0x19e   : > { %v1182_v9 = vadd.s32 %v1181_v4, %v1177_v35  ;;  %v3584_v40 = vsel %vm798_vm11, nan, %v808_v20  ;;  %2742 = vcosq.f32 %v898_v63  ;;  %v1111_v61 = vadd.s32 3, %v1107_v25  ;;  %v2739_v46 = vpop.eup %2738 }
 0x19f   : > { %vm1237_vm14 = vcmp.gt.s32.totalorder %v1236_v16, 0  ;;  %v1091_v60 = vshll.u32 %v3497_v41, %v1089_v24  ;;  %v1092_v27 = vshrl.u32 %v1074_v14, %v1090_v32  ;;  %v1095_v45 = vadd.s32 127, %v1094_v15  ;;  %v2741_v0 = vpop.eup %2740 }
 0x1a0   : > { %v1183_v57 = vadd.s32 536870912, %v1182_v9  ;;  %2744 = vsinq.f32 %v898_v63  ;;  %v1234_v6 = vor.u32 8388608, %v1233_v48  ;;  %v1238_v51 = vsel %vm1237_vm14, %v1236_v16, 0 }
 0x1a1   : > { %v699_v21 = vxor.u32 2147483648, %v3416_v56  ;;  %vm1010_vm9 = vcmp.eq.s32.totalorder %v3575_v2, 0  ;;  %v1093_v37 = vor.u32 %v1092_v27, %v1091_v60  ;;  %v1096_v54 = vshll.u32 %v1095_v45, 23 }
 0x1a2   : > { %v3589_v19 = vshrl.u32 %v1183_v57, 30  ;;  %vm1013_vm12 = vcmp.eq.s32.totalorder %v3575_v2, 2  ;;  %v1014_v22 = vxor.u32 2147483648, %v2739_v46  ;;  %v3592_v58 = vand.u32 3, %v1111_v61 }
 0x1a3   : > { %v1240_v41 = vand.u32 31, %v1238_v51  ;;  %v1011_v62 = vxor.u32 2147483648, %v2741_v0  ;;  %v1097_v49 = vor.u32 4788187, %v1096_v54  ;;  %vm698_vm13 = vcmp.eq.s32.totalorder %v3365_v50, 0 }
 0x1a4   : > { %v1185_v42 = vshll.u32 %v3589_v19, 30  ;;  %v3597_v36 = vadd.s32 %v3534_v8, %v3538_v39  ;;  %v3599_v63 = vshll.u32 %v1234_v6, 8  ;;  %v3602_v25 = vsel %vm698_vm13, %v3411_v12, %v699_v21 }
 0x1a5   : > { %v1241_v20 = vsub.s32 32, %v1240_v41  ;;  %v1098_v7 = vand.u32 2147483647, %v1097_v49  ;;  %v1100_v35 = vcvt.s32.f32 %v1093_v37  ;;  %vm701_vm15 = vcmp.eq.s32.totalorder %v3365_v50, 2 }
 0x1a6   : > { %v3604_v16 = vsub.s32 %v1182_v9, %v1185_v42  ;;  %v3609_v24 = vsel %vm1013_vm12, %v1014_v22, %v2741_v0  ;;  %v4681_v4 = vmov 2475754826   ;;  %v4682_v8 = vmov 2131351028   ;;  %v3633_v42 = vpop.f32.mrb[19].mxu0 }
 0x1a7   : > { %v1244_v48 = vshrl.u32 %v4681_v4, %v1241_v20  ;;  %v1247_v39 = vshrl.u32 %v4682_v8, %v1241_v20  ;;  %v702_v14 = vxor.u32 2147483648, %v3411_v12  ;;  %v3616_v32 = vsel %vm1010_vm9, %v2739_v46, %v1011_v62 }
 0x1a8   : > { %v1101_v15 = vmul.f32 %v1100_v35, %v1098_v7  ;;  %v1188_v9 = vsub.s32 0, %v3604_v16  ;;  %v4683_v61 = vmov 2102212464   ;;  %v3620_v27 = vpop.eup %2742  ;;  %v1239_v45 = vshrl.u32 %v1238_v51, 5 }
 0x1a9   : > { %v1250_v60 = vshrl.u32 %v4683_v61, %v1241_v20  ;;  %v1243_v57 = vshll.u32 %v4660_v1, %v1240_v41  ;;  %v1246_v0 = vshll.u32 %v4681_v4, %v1240_v41  ;;  %v1249_v6 = vshll.u32 %v4682_v8, %v1240_v41 }
 0x1aa   : > { %v1102_v21 = vxor.u32 2147483648, %v1101_v15  ;;  %v2550_v12 = vmin.u32 %v1188_v9, %v3604_v16  ;;  %v1252_v46 = vshll.u32 %v4683_v61, %v1240_v41  ;;  %v1253_v37 = vshrl.u32 %v4653_v11, %v1241_v20  ;;  %v3629_v54 = vpop.eup %2744 }
 0x1ab   : > { %vm697_vm5 = vcmp.lt.s32.totalorder %v3365_v50, 2  ;;  %v1245_v22 = vor.u32 %v1244_v48, %v1243_v57  ;;  %v1248_v62 = vor.u32 %v1247_v39, %v1246_v0  ;;  %v1251_v51 = vor.u32 %v1250_v60, %v1249_v6 }
 0x1ac   : > { %v1256_v49 = vshrl.u32 %v4676_v17, %v1241_v20  ;;  %vm694_vm1 = vweird.f32 %v2974_v34  ;;  %v1103_v7 = vsel %vm1020_vm0, %v1102_v21, %v1101_v15  ;;  %v1190_v35 = vclz %v2550_v12 }
 0x1ad   : > { %v1254_v9 = vor.u32 %v1253_v37, %v1252_v46  ;;  %v1255_v28 = vshll.u32 %v4653_v11, %v1240_v41  ;;  %vm1009_vm10 = vcmp.lt.s32.totalorder %v3575_v2, 2  ;;  %v1106_v48 = vsel %vm3559_vm6, %v2989_v53, %v1103_v7 }
 0x1ae   : > { %v1242_v39 = vshrl.u32 %v4660_v1, %v1241_v20  ;;  %vm1258_vm2 = vcmp.lt.s32.totalorder %v1239_v45, 1  ;;  %v703_v60 = vsel %vm701_vm15, %v702_v14, %v3416_v56  ;;  %2746 = vcosq.f32 %v1106_v48 }
 0x1af   : > { %v2551_v57 = vadd.s32 4294967294, %v1190_v35  ;;  %v1257_v15 = vor.u32 %v1256_v49, %v1255_v28  ;;  %vm1260_vm0 = vcmp.lt.s32.totalorder %v1239_v45, 3  ;;  %2748 = vsinq.f32 %v1106_v48 }
 0x1b0   : > { %vm1261_vm3 = vcmp.lt.s32.totalorder %v1239_v45, 4  ;;  %v1262_v41 = vsel %vm1258_vm2, %v1242_v39, %v1245_v22  ;;  %v1266_v0 = vsel %vm1258_vm2, %v1245_v22, %v1248_v62  ;;  %v1270_v31 = vsel %vm1258_vm2, %v1248_v62, %v1251_v51 }
 0x1b1   : > { %vm2552_vm4 = vcmp.lt.s32.totalorder %v2551_v57, 0  ;;  %v1263_v6 = vsel %vm1261_vm3, %v1251_v51, 2102212464  ;;  %v1267_v21 = vsel %vm1261_vm3, %v1254_v9, 920167782  ;;  %vm1006_vm11 = vweird.f32 %v2987_v52 }
 0x1b2   : > { %v1193_v12 = vsel %vm2552_vm4, 0, %v2551_v57  ;;  %v1264_v20 = vsel %vm1260_vm0, %v1248_v62, %v1263_v6  ;;  %v1268_v46 = vsel %vm1260_vm0, %v1251_v51, %v1267_v21  ;;  %v1271_v37 = vsel %vm1261_vm3, %v1257_v15, 1326507024 }
 0x1b3   : > { %v1194_v56 = vsub.s32 32, %v1193_v12  ;;  %v1195_v28 = vshll.u32 %v3604_v16, %v1193_v12  ;;  %v1198_v14 = vsub.s32 4294967266, %v1193_v12  ;;  %vm1259_vm6 = vcmp.lt.s32.totalorder %v1239_v45, 2 }
 0x1b4   : > { %v1265_v49 = vsel %vm1259_vm6, %v1262_v41, %v1264_v20  ;;  %v1269_v7 = vsel %vm1259_vm6, %v1266_v0, %v1268_v46  ;;  %v1272_v22 = vsel %vm1260_vm0, %v1254_v9, %v1271_v37  ;;  %v704_v35 = vsel %vm697_vm5, %v3602_v25, %v703_v60 }
 0x1b5   : > { %vm902_vm7 = vweird.f32 %v2985_v44  ;;  %v1196_v62 = vshrl.u32 %v3597_v36, %v1194_v56  ;;  %v1199_v51 = vadd.s32 127, %v1198_v14  ;;  %v1273_v48 = vsel %vm1259_vm6, %v1270_v31, %v1272_v22 }
 0x1b6   : > { %v705_v39 = vsel %vm694_vm1, nan, %v704_v35  ;;  %v3659_v16 = vmul.u32.u64.low %v3599_v63, %v1273_v48  ;;  %v3660_v57 = vmul.u32.u64.high %v3599_v63, %v1273_v48, %v3659_v16  ;;  %v1016_v50 = vsel %vm1009_vm10, %v3616_v32, %v3609_v24 }
 0x1b7   : > { %v3663_v45 = vmul.u32.u64.low %v3599_v63, %v1269_v7  ;;  %v3664_v9 = vmul.u32.u64.high %v3599_v63, %v1269_v7, %v3663_v45  ;;  %vm1124_vm8 = vcmp.lt.s32.totalorder %v2991_v55, 0  ;;  %v1197_v36 = vor.u32 %v1196_v62, %v1195_v28 }
 0x1b8   : > { %v1200_v25 = vshll.u32 %v1199_v51, 23  ;;  %v1281_v34 = vmul.u32 %v3599_v63, %v1265_v49  ;;  %vm905_vm14 = vcmp.lt.s32.totalorder %v3555_v5, 2  ;;  %v907_v60 = vxor.u32 2147483648, %v3629_v54  ;;  %v2747_v0 = vpop.eup %2746 }
 0x1b9   : > { %v910_v15 = vxor.u32 2147483648, %v3620_v27  ;;  %v2195_v41 = vmul.f32 %v3128_v23, %v705_v39  ;;  %v4684_v6 = vand.u32 2147483647, %v2991_v55  ;;  %vm906_vm12 = vcmp.eq.s32.totalorder %v3555_v5, 0  ;;  %v2749_v21 = vpop.eup %2748 }
 0x1ba   : > { %v1201_v24 = vor.u32 4788187, %v1200_v25  ;;  %v2194_v63 = vmul.f32 %v3114_v47, %v3543_v18  ;;  %v2196_v32 = vmul.f32 %v3132_v13, %v3584_v40  ;;  %vm1283_vm13 = vc.u32 %v3660_v57, %v3663_v45 }
 0x1bb   : > { %vm3679_vm9 = vcmp.le.f32.partialorder %v4684_v6, 0.7853982  ;;  %v1284_v23 = vadd.s32 1, %v3664_v9  ;;  %v908_v31 = vsel %vm906_vm12, %v3620_v27, %v907_v60  ;;  %vm909_vm15 = vcmp.eq.s32.totalorder %v3555_v5, 2 }
 0x1bc   : > { %v1202_v12 = vand.u32 2147483647, %v1201_v24  ;;  %v1204_v20 = vcvt.s32.f32 %v1197_v36  ;;  %v911_v46 = vsel %vm909_vm15, %v910_v15, %v3629_v54  ;;  %v2206_v37 = vpack.c.bf16 %v2196_v32, %v2194_v63  ;;  %v2184_v24 = vpop.permute.xlu1 %2183 }
 0x1bd   : > { %v1017_v47 = vsel %vm1006_vm11, nan, %v1016_v50  ;;  %v1208_v13 = vsub.s32 4, %v3589_v19  ;;  %v1285_v18 = vsel %vm1283_vm13, %v1284_v23, %v3664_v9  ;;  %v912_v40 = vsel %vm905_vm14, %v908_v31, %v911_v46  ;;  %v3723_v50 = vpop.f32.mrb[0].mxu1 }
 0x1be   : > { %v1205_v56 = vmul.f32 %v1204_v20, %v1202_v12  ;;  %v1286_v28 = vadd.s32 %v1285_v18, %v1281_v34  ;;  %v913_v27 = vsel %vm902_vm7, nan, %v912_v40  ;;  %v1115_v14 = vxor.u32 2147483648, %v2749_v21  ;;  %4687 = vst [vmem:[#allocation2_spill] sm:$0xff] %v3723_v50  ;;  %v3729_v18 = vpop.f32.mrb[1].mxu1 }
 0x1bf   : > { %v2197_v49 = vmul.f32 %v3146_v33, %v913_v27  ;;  %vm1114_vm5 = vcmp.eq.s32.totalorder %v3592_v58, 0  ;;  %vm1117_vm1 = vcmp.eq.s32.totalorder %v3592_v58, 2  ;;  %v1118_v52 = vxor.u32 2147483648, %v2747_v0  ;;  %4688 = vst [vmem:[#allocation3_spill] sm:$0xff] %v3729_v18 }
 0x1c0   : > { %v1206_v54 = vxor.u32 2147483648, %v1205_v56  ;;  %v1287_v7 = vadd.s32 536870912, %v1286_v28  ;;  %v1116_v22 = vsel %vm1114_vm5, %v2747_v0, %v1115_v14  ;;  %v3706_v35 = vmul.f32 %v3161_v26, %v1017_v47 }
 0x1c1   : > { %v1209_v5 = vsel %vm1124_vm8, %v1208_v13, %v3589_v19  ;;  %v2207_v44 = vpack.c.bf16 %v2197_v49, %v2195_v41  ;;  %vm1113_vm10 = vcmp.lt.s32.totalorder %v3592_v58, 2  ;;  %v1119_v62 = vsel %vm1117_vm1, %v1118_v52, %v2749_v21 }
 0x1c2   : > { %v1207_v33 = vsel %vm1124_vm8, %v1206_v54, %v1205_v56  ;;  %v1288_v51 = vshrl.u32 %v1287_v7, 30  ;;  %vm1110_vm2 = vweird.f32 %v2989_v53  ;;  %v1120_v48 = vsel %vm1113_vm10, %v1116_v22, %v1119_v62  ;;  %v3731_v56 = vpop.f32.mrb[2].mxu1 }
 0x1c3   : > { %v1210_v26 = vsel %vm3679_vm9, %v2991_v55, %v1207_v33  ;;  %2252 = vmatprep.subr.bf16.mxu1 %v2207_v44  ;;  %v1121_v39 = vsel %vm1110_vm2, nan, %v1120_v48  ;;  %v1211_v58 = vsel %vm3679_vm9, 0, %v1209_v5  ;;  %v1282_v21 = vadd.s32 %v3663_v45, %v3660_v57  ;;  %4689 = vst [vmem:[#allocation4_spill] sm:$0xff] %v3731_v56  ;;  %v3733_v14 = vpop.f32.mrb[3].mxu1 }
 0x1c4   : > { %2750 = vcosq.f32 %v1210_v26  ;;  %v1289_v16 = vshll.u32 %v1288_v51, 30  ;;  %2253 = vmatpush1.bf16.msra.mxu1 %v2206_v37  ;;  %v3719_v19 = vmul.f32 %v3166_v43, %v1121_v39  ;;  %v1215_v53 = vadd.s32 3, %v1211_v58  ;;  %4690 = vst [vmem:[#allocation5_spill] sm:$0xff] %v3733_v14 }
 0x1c5   : > { %2752 = vsinq.f32 %v1210_v26  ;;  %v2192_v12 = vadd.f32 %v2184_v24, %v2966_v29  ;;  %vm1214_vm6 = vweird.f32 %v2991_v55  ;;  %v1312_v52 = vsub.s32 4, %v1288_v51 }
 0x1c6   : > { %v1290_v9 = vsub.s32 %v1286_v28, %v1289_v16  ;;  %v1216_v34 = vand.u32 3, %v1215_v53  ;;  %v1333_v54 = vand.u32 2139095040, %v3436_v10  ;;  %vm1228_vm7 = vcmp.lt.s32.totalorder %v2993_v59, 0 }
 0x1c7   : > { %v4691_v22 = vand.u32 2147483647, %v2993_v59  ;;  %v1313_v44 = vsel %vm1228_vm7, %v1312_v52, %v1288_v51  ;;  %vm1318_vm15 = vweird.f32 %v2993_v59  ;;  %vm2245_vm5 = vcmask 261120  }
 0x1c8   : > { %v1292_v36 = vsub.s32 0, %v1290_v9  ;;  %vm1221_vm0 = vcmp.eq.s32.totalorder %v1216_v34, 2  ;;  %vm1217_vm4 = vcmp.lt.s32.totalorder %v1216_v34, 2  ;;  %vm1218_vm11 = vcmp.eq.s32.totalorder %v1216_v34, 0 }
 0x1c9   : > { %vm1227_vm8 = vcmp.le.f32.partialorder %v4691_v22, 0.7853982  ;;  %v1334_v33 = vshrl.u32 %v1333_v54, 23  ;;  %v1541_v22 = vand.u32 2139095040, %v3552_v38 }
 0x1ca   : > { %v2554_v25 = vmin.u32 %v1292_v36, %v1290_v9 }
 0x1cb   : > { %v2557_v48 = vadd.s32 4294967169, %v1334_v33 }
 0x1cc   : > { %v1294_v60 = vclz %v2554_v25 }
 0x1cd   : > { %v1340_v39 = vadd.s32 1, %v2557_v48 }
 0x1ce   : > { %v2751_v15 = vpop.eup %2750  ;;  %v2555_v41 = vadd.s32 4294967294, %v1294_v60 }
 0x1cf   : > { %v2753_v0 = vpop.eup %2752  ;;  %v1222_v6 = vxor.u32 2147483648, %v2751_v15  ;;  %vm1341_vm14 = vcmp.gt.s32.totalorder %v1340_v39, 0 }
 0x1d0   : > { %v1219_v63 = vxor.u32 2147483648, %v2753_v0  ;;  %vm2556_vm3 = vcmp.lt.s32.totalorder %v2555_v41, 0  ;;  %v1342_v60 = vsel %vm1341_vm14, %v1340_v39, 0 }
 0x1d1   : > { %v1223_v43 = vsel %vm1221_vm0, %v1222_v6, %v2753_v0  ;;  %v1297_v2 = vsel %vm2556_vm3, 0, %v2555_v41  ;;  %v2193_v41 = vadd.f32 %v2184_v24, %v2968_v30  ;;  %v4692_v24 = vmov 0  }
 0x1d2   : > { %v1220_v32 = vsel %vm1218_vm11, %v2751_v15, %v1219_v63  ;;  %v1298_v23 = vsub.s32 32, %v1297_v2  ;;  %v1302_v31 = vsub.s32 4294967266, %v1297_v2  ;;  %v1299_v37 = vshll.u32 %v1290_v9, %v1297_v2 }
 0x1d3   : > { %v1224_v20 = vsel %vm1217_vm4, %v1220_v32, %v1223_v43  ;;  %v1437_v9 = vand.u32 2139095040, %v3460_v3  ;;  %v1344_v43 = vand.u32 31, %v1342_v60 }
 0x1d4   : > { %v1225_v46 = vsel %vm1214_vm6, nan, %v1224_v20  ;;  %v1300_v47 = vshrl.u32 %v1282_v21, %v1298_v23  ;;  %v1303_v13 = vadd.s32 127, %v1302_v31  ;;  %v2724_v21 = vld [vmem:[%s4629_s4] sm:$0xff]  }
 0x1d5   : > { %v2200_v40 = vmul.f32 %v2192_v12, %v1225_v46  ;;  %v1438_v15 = vshrl.u32 %v1437_v9, 23  ;;  %v3748_v23 = vsub.s32 32, %v1344_v43  ;;  %v1356_v30 = vshll.u32 %v4683_v61, %v1344_v43 }
 0x1d6   : > { %v1301_v28 = vor.u32 %v1300_v47, %v1299_v37  ;;  %v1304_v27 = vshll.u32 %v1303_v13, 23  ;;  %v3756_v12 = vshrl.u32 %v1342_v60, 5  ;;  %v1347_v20 = vshll.u32 %v4660_v1, %v1344_v43 }
 0x1d7   : > { %v2208_v57 = vpack.c.bf16 %v2200_v40, %v3706_v35  ;;  %v1315_v35 = vsel %vm1227_vm8, 0, %v1313_v44  ;;  %v2561_v2 = vadd.s32 4294967169, %v1438_v15  ;;  %v1350_v46 = vshll.u32 %v4681_v4, %v1344_v43 }
 0x1d8   : > { %v1305_v45 = vor.u32 4788187, %v1304_v27  ;;  %v1308_v49 = vcvt.s32.f32 %v1301_v28  ;;  %v1319_v26 = vadd.s32 3, %v1315_v35  ;;  %v1359_v37 = vshll.u32 %v4653_v11, %v1344_v43 }
 0x1d9   : > { %v1444_v31 = vadd.s32 1, %v2561_v2  ;;  %v1360_v47 = vshrl.u32 %v4676_v17, %v3748_v23  ;;  %v1348_v13 = vshrl.u32 %v4681_v4, %v3748_v23  ;;  %v1351_v40 = vshrl.u32 %v4682_v8, %v3748_v23 }
 0x1da   : > { %v1306_v29 = vand.u32 2147483647, %v1305_v45  ;;  %v1320_v16 = vand.u32 3, %v1319_v26  ;;  %v1353_v28 = vshll.u32 %v4682_v8, %v1344_v43  ;;  %v1354_v27 = vshrl.u32 %v4683_v61, %v3748_v23 }
 0x1db   : > { %vm1445_vm1 = vcmp.gt.s32.totalorder %v1444_v31, 0  ;;  %vm1365_vm10 = vcmp.lt.s32.totalorder %v3756_v12, 4  ;;  %v1349_v52 = vor.u32 %v1348_v13, %v1347_v20  ;;  %v1352_v54 = vor.u32 %v1351_v40, %v1350_v46 }
 0x1dc   : > { %v1309_v55 = vmul.f32 %v1308_v49, %v1306_v29  ;;  %vm1325_vm9 = vcmp.eq.s32.totalorder %v1320_v16, 2  ;;  %vm1322_vm12 = vcmp.eq.s32.totalorder %v1320_v16, 0  ;;  %vm1321_vm13 = vcmp.lt.s32.totalorder %v1320_v16, 2 }
 0x1dd   : > { %v1361_v49 = vor.u32 %v1360_v47, %v1359_v37  ;;  %vm1362_vm2 = vcmp.lt.s32.totalorder %v3756_v12, 1  ;;  %vm1364_vm0 = vcmp.lt.s32.totalorder %v3756_v12, 3  ;;  %vm1363_vm3 = vcmp.lt.s32.totalorder %v3756_v12, 2 }
 0x1de   : > { %v1310_v7 = vxor.u32 2147483648, %v1309_v55  ;;  %v1370_v35 = vsel %vm1362_vm2, %v1349_v52, %v1352_v54  ;;  %v1542_v26 = vshrl.u32 %v1541_v22, 23  ;;  %v1645_v43 = vand.u32 2139095040, %v3633_v42 }
 0x1df   : > { %v1375_v33 = vsel %vm1365_vm10, %v1361_v49, 1326507024  ;;  %v1346_v13 = vshrl.u32 %v4660_v1, %v3748_v23  ;;  %v1749_v12 = vand.u32 2139095040, %v3723_v50 }
 0x1e0   : > { %v1311_v5 = vsel %vm1228_vm7, %v1310_v7, %v1309_v55  ;;  %v1446_v55 = vsel %vm1445_vm1, %v1444_v31, 0  ;;  %v1355_v7 = vor.u32 %v1354_v27, %v1353_v28  ;;  %v1646_v28 = vshrl.u32 %v1645_v43, 23 }
 0x1e1   : > { %v1314_v62 = vsel %vm1227_vm8, %v2993_v59, %v1311_v5  ;;  %v1357_v59 = vshrl.u32 %v4653_v11, %v3748_v23  ;;  %v1366_v23 = vsel %vm1362_vm2, %v1346_v13, %v1349_v52 }
 0x1e2   : > { %2754 = vcosq.f32 %v1314_v62  ;;  %v1374_v39 = vsel %vm1362_vm2, %v1352_v54, %v1355_v7  ;;  %v1367_v27 = vsel %vm1365_vm10, %v1355_v7, 2102212464 }
 0x1e3   : > { %2756 = vsinq.f32 %v1314_v62  ;;  %v1358_v45 = vor.u32 %v1357_v59, %v1356_v30  ;;  %v1448_v62 = vand.u32 31, %v1446_v55  ;;  %v1368_v22 = vsel %vm1364_vm0, %v1352_v54, %v1367_v27 }
 0x1e5   : > { %v1371_v5 = vsel %vm1365_vm10, %v1358_v45, 920167782  ;;  %v1376_v16 = vsel %vm1364_vm0, %v1358_v45, %v1375_v33  ;;  %v1449_v9 = vsub.s32 32, %v1448_v62  ;;  %v1460_v15 = vshll.u32 %v4683_v61, %v1448_v62 }
 0x1e6   : > { %v1372_v48 = vsel %vm1364_vm0, %v1355_v7, %v1371_v5  ;;  %v1451_v2 = vshll.u32 %v4660_v1, %v1448_v62  ;;  %v1457_v59 = vshll.u32 %v4682_v8, %v1448_v62  ;;  %v2569_v5 = vadd.s32 4294967169, %v1646_v28 }
 0x1e7   : > { %v1452_v31 = vshrl.u32 %v4681_v4, %v1449_v9  ;;  %v1455_v30 = vshrl.u32 %v4682_v8, %v1449_v9 }
 0x1ec   : > { %v2755_v58 = vpop.eup %2754 }
 0x1ed   : > { %v2757_v53 = vpop.eup %2756  ;;  %v1326_v36 = vxor.u32 2147483648, %v2755_v58 }
 0x1ee   : > { %v1323_v25 = vxor.u32 2147483648, %v2757_v53 }
 0x1ef   : > { %v1327_v51 = vsel %vm1325_vm9, %v1326_v36, %v2757_v53  ;;  %v1373_v53 = vsel %vm1363_vm3, %v1370_v35, %v1372_v48  ;;  %v2565_v36 = vadd.s32 4294967169, %v1542_v26  ;;  %v1369_v35 = vsel %vm1363_vm3, %v1366_v23, %v1368_v22 }
 0x1f0   : > { %v1324_v34 = vsel %vm1322_vm12, %v2755_v58, %v1323_v25  ;;  %v1377_v25 = vsel %vm1363_vm3, %v1374_v39, %v1376_v16  ;;  %v1652_v16 = vadd.s32 1, %v2569_v5 }
 0x1f1   : > { %v1328_v0 = vsel %vm1321_vm13, %v1324_v34, %v1327_v51  ;;  %v4650_v51 = vand.u32 2147483647, %v3460_v3 }
 0x1f2   : > { %v1329_v6 = vsel %vm1318_vm15, nan, %v1328_v0  ;;  %v3808_v0 = vshrl.u32 %v1446_v55, 5  ;;  %vm1653_vm9 = vcmp.gt.s32.totalorder %v1652_v16, 0 }
 0x1f3   : > { %v2201_v63 = vmul.f32 %v2193_v41, %v1329_v6  ;;  %v1461_v41 = vshrl.u32 %v4653_v11, %v1449_v9  ;;  %v1463_v6 = vshll.u32 %v4653_v11, %v1448_v62  ;;  %v1441_v37 = vand.u32 8388607, %v4650_v51 }
 0x1f4   : > { %vm1469_vm4 = vcmp.lt.s32.totalorder %v3808_v0, 4  ;;  %vm1466_vm6 = vcmp.lt.s32.totalorder %v3808_v0, 1  ;;  %vm1468_vm7 = vcmp.lt.s32.totalorder %v3808_v0, 3  ;;  %vm1467_vm8 = vcmp.lt.s32.totalorder %v3808_v0, 2 }
 0x1f5   : > { %v2209_v32 = vpack.c.bf16 %v2201_v63, %v3719_v19  ;;  %v4651_v19 = vand.u32 2147483647, %v3436_v10  ;;  %v1464_v63 = vshrl.u32 %v4676_v17, %v1449_v9  ;;  %v1462_v47 = vor.u32 %v1461_v41, %v1460_v15 }
 0x1f6   : > { %v1442_v49 = vor.u32 8388608, %v1441_v37  ;;  %v4649_v15 = vand.u32 2147483647, %v3552_v38 }
 0x1f7   : > { %2254 = vmatprep.subr.bf16.mxu1 %v2209_v32  ;;  %v1337_v29 = vand.u32 8388607, %v4651_v19  ;;  %v1454_v32 = vshll.u32 %v4681_v4, %v1448_v62  ;;  %v1465_v40 = vor.u32 %v1464_v63, %v1463_v6  ;;  %v1475_v55 = vsel %vm1469_vm4, %v1462_v47, 920167782 }
 0x1f8   : > { %2255 = vmatpush1.bf16.msra.mxu1 %v2208_v57  ;;  %v2725_v57 = vld [vmem:[%s4629_s4 + $0x8] sm:$0xff]   ;;  %v3854_v26 = vshll.u32 %v1442_v49, 8  ;;  %v1450_v6 = vshrl.u32 %v4660_v1, %v1449_v9 }
 0x1f9   : > { %v1338_v44 = vor.u32 8388608, %v1337_v29  ;;  %v1456_v45 = vor.u32 %v1455_v30, %v1454_v32  ;;  %v1479_v7 = vsel %vm1469_vm4, %v1465_v40, 1326507024 }
 0x1fa   : > { %v1480_v48 = vsel %vm1468_vm7, %v1462_v47, %v1479_v7 }
 0x1fb   : > { %2595 = vmatmul.mubr.msk.bf16.vlgmr.msra.gmra.mrb[4].mxu1 %vm2245_vm5, %v2724_v21  ;;  %v3794_v58 = vshll.u32 %v1338_v44, 8  ;;  %v1548_v21 = vadd.s32 1, %v2565_v36 }
 0x1fc   : > { %2294 = vmatprep.mubr.bf16.mxu1 %v4692_v24 }
 0x1fd   : > { %v3802_v34 = vmul.u32.u64.low %v3794_v58, %v1373_v53  ;;  %v3803_v60 = vmul.u32.u64.high %v3794_v58, %v1373_v53, %v3802_v34  ;;  %v3820_v20 = vmul.u32.u64.low %v3794_v58, %v1377_v25  ;;  %v3821_v46 = vmul.u32.u64.high %v3794_v58, %v1377_v25, %v3820_v20 }
 0x1fe   : > { %vm1549_vm11 = vcmp.gt.s32.totalorder %v1548_v21, 0  ;;  %v1385_v36 = vmul.u32 %v3794_v58, %v1369_v35  ;;  %v1654_v20 = vsel %vm1653_vm9, %v1652_v16, 0 }
 0x1ff   : > { %v1550_v44 = vsel %vm1549_vm11, %v1548_v21, 0  ;;  %v1388_v52 = vadd.s32 1, %v3803_v60  ;;  %vm1387_vm14 = vc.u32 %v3821_v46, %v3802_v34  ;;  %v1656_v23 = vand.u32 31, %v1654_v20 }
 0x200   : > { %v1552_v39 = vand.u32 31, %v1550_v44 }
 0x201   : > { %v1389_v41 = vsel %vm1387_vm14, %v1388_v52, %v3803_v60  ;;  %v3904_v16 = vsub.s32 32, %v1656_v23 }
 0x202   : > { %v1553_v32 = vsub.s32 32, %v1552_v39  ;;  %v3876_v30 = vadd.s32 %v1389_v41, %v1385_v36  ;;  %v1555_v37 = vshll.u32 %v4660_v1, %v1552_v39  ;;  %v1558_v47 = vshll.u32 %v4681_v4, %v1552_v39 }
 0x203   : > { %2596 = vmatmul.mubr.msk.bf16.gmra.mrb[8].mxu1 %vm2245_vm5, %v2725_v57  ;;  %v1453_v57 = vor.u32 %v1452_v31, %v1451_v2  ;;  %v1750_v31 = vshrl.u32 %v1749_v12, 23  ;;  %v1564_v13 = vshll.u32 %v4683_v61, %v1552_v39  ;;  %v1561_v28 = vshll.u32 %v4682_v8, %v1552_v39 }
 0x204   : > { %2363 = vmatprep.mubr.bf16.mxu1 %v4692_v24  ;;  %v1458_v24 = vshrl.u32 %v4683_v61, %v1449_v9  ;;  %v1545_v9 = vand.u32 8388607, %v4649_v15  ;;  %v1565_v40 = vshrl.u32 %v4653_v11, %v1553_v32  ;;  %v1567_v27 = vshll.u32 %v4653_v11, %v1552_v39 }
 0x205   : > { %v1474_v62 = vsel %vm1466_vm6, %v1453_v57, %v1456_v45  ;;  %v1470_v60 = vsel %vm1466_vm6, %v1450_v6, %v1453_v57  ;;  %v1568_v57 = vshrl.u32 %v4676_v17, %v1553_v32  ;;  %v1559_v49 = vshrl.u32 %v4682_v8, %v1553_v32 }
 0x206   : > { %v1459_v29 = vor.u32 %v1458_v24, %v1457_v59  ;;  %v3884_v24 = vshrl.u32 %v1550_v44, 5  ;;  %v1391_v22 = vadd.s32 536870912, %v3876_v30  ;;  %v1546_v7 = vor.u32 8388608, %v1545_v9 }
 0x207   : > { %v1569_v35 = vor.u32 %v1568_v57, %v1567_v27  ;;  %v1554_v41 = vshrl.u32 %v4660_v1, %v1553_v32  ;;  %v3931_v9 = vshrl.u32 %v1654_v20, 5  ;;  %v1663_v20 = vshrl.u32 %v4682_v8, %v3904_v16 }
 0x208   : > { %v1476_v33 = vsel %vm1468_vm7, %v1459_v29, %v1475_v55  ;;  %v1478_v54 = vsel %vm1466_vm6, %v1456_v45, %v1459_v29  ;;  %v1471_v63 = vsel %vm1469_vm4, %v1459_v29, 2102212464  ;;  %v2573_v29 = vadd.s32 4294967169, %v1750_v31 }
 0x209   : > { %v1477_v53 = vsel %vm1467_vm8, %v1474_v62, %v1476_v33  ;;  %v1481_v25 = vsel %vm1467_vm8, %v1478_v54, %v1480_v48  ;;  %v1472_v59 = vsel %vm1468_vm7, %v1456_v45, %v1471_v63  ;;  %v1556_v45 = vshrl.u32 %v4681_v4, %v1553_v32 }
 0x20a   : > { %v3868_v43 = vmul.u32.u64.low %v3854_v26, %v1477_v53  ;;  %v3869_v2 = vmul.u32.u64.high %v3854_v26, %v1477_v53, %v3868_v43  ;;  %v3873_v58 = vmul.u32.u64.low %v3854_v26, %v1481_v25  ;;  %v3874_v21 = vmul.u32.u64.high %v3854_v26, %v1481_v25, %v3873_v58 }
 0x20b   : > { %v1562_v55 = vshrl.u32 %v4683_v61, %v1553_v32  ;;  %v1473_v5 = vsel %vm1467_vm8, %v1470_v60, %v1472_v59  ;;  %v1566_v62 = vor.u32 %v1565_v40, %v1564_v13  ;;  %v4648_v33 = vand.u32 2147483647, %v3633_v42 }
 0x20c   : > { %v1492_v44 = vadd.s32 1, %v3869_v2  ;;  %vm1491_vm12 = vc.u32 %v3874_v21, %v3868_v43  ;;  %vm1573_vm13 = vcmp.lt.s32.totalorder %v3884_v24, 4  ;;  %v1756_v52 = vadd.s32 1, %v2573_v29 }
 0x20d   : > { %v1557_v54 = vor.u32 %v1556_v45, %v1555_v37  ;;  %v1560_v48 = vor.u32 %v1559_v49, %v1558_v47  ;;  %v1563_v39 = vor.u32 %v1562_v55, %v1561_v28  ;;  %v3906_v53 = vshrl.u32 %v1391_v22, 30 }
 0x20e   : > { %v1489_v0 = vmul.u32 %v3854_v26, %v1473_v5  ;;  %vm1570_vm15 = vcmp.lt.s32.totalorder %v3884_v24, 1  ;;  %v3910_v12 = vshll.u32 %v1546_v7, 8  ;;  %v1493_v36 = vsel %vm1491_vm12, %v1492_v44, %v3869_v2 }
 0x20f   : > { %vm1571_vm1 = vcmp.lt.s32.totalorder %v3884_v24, 2  ;;  %vm1572_vm10 = vcmp.lt.s32.totalorder %v3884_v24, 3  ;;  %v1579_v25 = vsel %vm1573_vm13, %v1566_v62, 920167782  ;;  %v1575_v6 = vsel %vm1573_vm13, %v1563_v39, 2102212464 }
 0x210   : > { %v1583_v26 = vsel %vm1573_vm13, %v1569_v35, 1326507024  ;;  %vm1757_vm2 = vcmp.gt.s32.totalorder %v1756_v52, 0  ;;  %v1578_v63 = vsel %vm1570_vm15, %v1557_v54, %v1560_v48  ;;  %v1582_v2 = vsel %vm1570_vm15, %v1560_v48, %v1563_v39 }
 0x211   : > { %v1668_v58 = vshll.u32 %v4683_v61, %v1656_v23  ;;  %v1669_v31 = vshrl.u32 %v4653_v11, %v3904_v16  ;;  %v1580_v32 = vsel %vm1572_vm10, %v1563_v39, %v1579_v25  ;;  %v1671_v60 = vshll.u32 %v4653_v11, %v1656_v23 }
 0x212   : > { %v1672_v59 = vshrl.u32 %v4676_v17, %v3904_v16  ;;  %v1584_v37 = vsel %vm1572_vm10, %v1566_v62, %v1583_v26  ;;  %v1659_v47 = vshll.u32 %v4660_v1, %v1656_v23  ;;  %v1662_v13 = vshll.u32 %v4681_v4, %v1656_v23 }
 0x213   : > { %v1758_v40 = vsel %vm1757_vm2, %v1756_v52, 0  ;;  %v1660_v28 = vshrl.u32 %v4681_v4, %v3904_v16  ;;  %v1665_v27 = vshll.u32 %v4682_v8, %v1656_v23  ;;  %v1666_v57 = vshrl.u32 %v4683_v61, %v3904_v16 }
 0x214   : > { %v1393_v29 = vshll.u32 %v3906_v53, 30  ;;  %v1574_v45 = vsel %vm1570_vm15, %v1554_v41, %v1557_v54  ;;  %v1670_v49 = vor.u32 %v1669_v31, %v1668_v58  ;;  %v1853_v55 = vand.u32 2139095040, %v3729_v18 }
 0x215   : > { %v1576_v22 = vsel %vm1572_vm10, %v1560_v48, %v1575_v6  ;;  %v1673_v7 = vor.u32 %v1672_v59, %v1671_v60  ;;  %vm1677_vm0 = vcmp.lt.s32.totalorder %v3931_v9, 4  ;;  %v1760_v5 = vand.u32 31, %v1758_v40 }
 0x216   : > { %v3954_v44 = vadd.s32 %v1493_v36, %v1489_v0  ;;  %v1581_v23 = vsel %vm1571_vm1, %v1578_v63, %v1580_v32  ;;  %v1585_v62 = vsel %vm1571_vm1, %v1582_v2, %v1584_v37  ;;  %v1649_v35 = vand.u32 8388607, %v4648_v33 }
 0x217   : > { %v3962_v52 = vor.u32 %v1660_v28, %v1659_v47  ;;  %v3964_v54 = vor.u32 %v1663_v20, %v1662_v13  ;;  %v1667_v48 = vor.u32 %v1666_v57, %v1665_v27  ;;  %v1854_v39 = vshrl.u32 %v1853_v55, 23 }
 0x218   : > { %v3968_v25 = vsel %vm1571_vm1, %v1574_v45, %v1576_v22  ;;  %vm1674_vm3 = vcmp.lt.s32.totalorder %v3931_v9, 1  ;;  %vm1676_vm4 = vcmp.lt.s32.totalorder %v3931_v9, 3  ;;  %v1683_v0 = vsel %vm1677_vm0, %v1670_v49, 920167782 }
 0x219   : > { %v3975_v36 = vmul.u32.u64.low %v3910_v12, %v1585_v62  ;;  %v3976_v41 = vmul.u32.u64.high %v3910_v12, %v1585_v62, %v3975_v36  ;;  %v1687_v6 = vsel %vm1677_vm0, %v1673_v7, 1326507024  ;;  %v3980_v26 = vsub.s32 32, %v1760_v5 }
 0x21a   : > { %v3983_v24 = vmul.u32.u64.low %v3910_v12, %v1581_v23  ;;  %v3984_v63 = vmul.u32.u64.high %v3910_v12, %v1581_v23, %v3983_v24  ;;  %v1650_v2 = vor.u32 8388608, %v1649_v35  ;;  %v1957_v58 = vand.u32 2139095040, %v3731_v56 }
 0x21b   : > { %vm1675_vm11 = vcmp.lt.s32.totalorder %v3931_v9, 2  ;;  %v1682_v31 = vsel %vm1674_vm3, %v3962_v52, %v3964_v54  ;;  %v1684_v32 = vsel %vm1676_vm4, %v1667_v48, %v1683_v0  ;;  %v2577_v60 = vadd.s32 4294967169, %v1854_v39 }
 0x21c   : > { %v1593_v59 = vmul.u32 %v3910_v12, %v3968_v25  ;;  %v1686_v37 = vsel %vm1674_vm3, %v3964_v54, %v1667_v48  ;;  %v1688_v47 = vsel %vm1676_vm4, %v1670_v49, %v1687_v6  ;;  %v4647_v13 = vand.u32 2147483647, %v3723_v50 }
 0x21d   : > { %v1772_v28 = vshll.u32 %v4683_v61, %v1760_v5  ;;  %v1773_v20 = vshrl.u32 %v4653_v11, %v3980_v26  ;;  %v1775_v27 = vshll.u32 %v4653_v11, %v1760_v5  ;;  %v1776_v57 = vshrl.u32 %v4676_v17, %v3980_v26 }
 0x21e   : > { %v1685_v12 = vsel %vm1675_vm11, %v1682_v31, %v1684_v32  ;;  %v4011_v45 = vshll.u32 %v1650_v2, 8  ;;  %v4013_v55 = vshrl.u32 %v1758_v40, 5  ;;  %v1958_v49 = vshrl.u32 %v1957_v58, 23 }
 0x21f   : > { %v1689_v22 = vsel %vm1675_vm11, %v1686_v37, %v1688_v47  ;;  %v1763_v7 = vshll.u32 %v4660_v1, %v1760_v5  ;;  %v1766_v23 = vshll.u32 %v4681_v4, %v1760_v5  ;;  %v1860_v62 = vadd.s32 1, %v2577_v60 }
 0x220   : > { %v1764_v35 = vshrl.u32 %v4681_v4, %v3980_v26  ;;  %v1767_v39 = vshrl.u32 %v4682_v8, %v3980_v26  ;;  %v1769_v25 = vshll.u32 %v4682_v8, %v1760_v5  ;;  %v1770_v40 = vshrl.u32 %v4683_v61, %v3980_v26 }
 0x221   : > { %vm1595_vm6 = vc.u32 %v3976_v41, %v3983_v24  ;;  %v1753_v0 = vand.u32 8388607, %v4647_v13  ;;  %v1774_v36 = vor.u32 %v1773_v20, %v1772_v28  ;;  %v1777_v6 = vor.u32 %v1776_v57, %v1775_v27 }
 0x222   : > { %v4031_v2 = vmul.u32.u64.low %v4011_v45, %v1689_v22  ;;  %v4032_v58 = vmul.u32.u64.high %v4011_v45, %v1689_v22, %v4031_v2  ;;  %vm1781_vm7 = vcmp.lt.s32.totalorder %v4013_v55, 4  ;;  %v2581_v31 = vadd.s32 4294967169, %v1958_v49 }
 0x223   : > { %v1596_v5 = vadd.s32 1, %v3984_v63  ;;  %v4037_v32 = vmul.u32.u64.low %v4011_v45, %v1685_v12  ;;  %v4038_v60 = vmul.u32.u64.high %v4011_v45, %v1685_v12, %v4037_v32  ;;  %vm1861_vm8 = vcmp.gt.s32.totalorder %v1860_v62, 0 }
 0x224   : > { %v1658_v37 = vshrl.u32 %v4660_v1, %v3904_v16  ;;  %v1765_v47 = vor.u32 %v1764_v35, %v1763_v7  ;;  %v1768_v28 = vor.u32 %v1767_v39, %v1766_v23  ;;  %v1771_v20 = vor.u32 %v1770_v40, %v1769_v25 }
 0x225   : > { %vm1778_vm14 = vcmp.lt.s32.totalorder %v4013_v55, 1  ;;  %vm1780_vm9 = vcmp.lt.s32.totalorder %v4013_v55, 3  ;;  %v1787_v27 = vsel %vm1781_vm7, %v1774_v36, 920167782  ;;  %v1791_v57 = vsel %vm1781_vm7, %v1777_v6, 1326507024 }
 0x226   : > { %v1679_v12 = vsel %vm1677_vm0, %v1667_v48, 2102212464  ;;  %v1754_v49 = vor.u32 8388608, %v1753_v0  ;;  %v1862_v22 = vsel %vm1861_vm8, %v1860_v62, 0  ;;  %v1964_v2 = vadd.s32 1, %v2581_v31 }
 0x227   : > { %v4054_v16 = vsub.s32 %v3876_v30, %v1393_v29  ;;  %v1597_v7 = vsel %vm1595_vm6, %v1596_v5, %v3984_v63  ;;  %vm1779_vm12 = vcmp.lt.s32.totalorder %v4013_v55, 2  ;;  %v1786_v23 = vsel %vm1778_vm14, %v1765_v47, %v1768_v28 }
 0x228   : > { %v1788_v48 = vsel %vm1780_vm9, %v1771_v20, %v1787_v27  ;;  %v1790_v62 = vsel %vm1778_vm14, %v1768_v28, %v1771_v20  ;;  %v1792_v30 = vsel %vm1780_vm9, %v1774_v36, %v1791_v57  ;;  %v1495_v29 = vadd.s32 536870912, %v3954_v44 }
 0x229   : > { %v1678_v63 = vsel %vm1674_vm3, %v1658_v37, %v3962_v52  ;;  %v1680_v35 = vsel %vm1676_vm4, %v3964_v54, %v1679_v12  ;;  %v1864_v39 = vand.u32 31, %v1862_v22  ;;  %v4076_v25 = vadd.s32 %v1597_v7, %v1593_v59 }
 0x22a   : > { %v4078_v40 = vshll.u32 %v1754_v49, 8  ;;  %vm1965_vm13 = vcmp.gt.s32.totalorder %v1964_v2, 0  ;;  %v1700_v0 = vadd.s32 1, %v4038_v60  ;;  %v1762_v36 = vshrl.u32 %v4660_v1, %v3980_v26 }
 0x22b   : > { %v1789_v6 = vsel %vm1779_vm12, %v1786_v23, %v1788_v48  ;;  %v1793_v52 = vsel %vm1779_vm12, %v1790_v62, %v1792_v30  ;;  %v1681_v54 = vsel %vm1675_vm11, %v1678_v63, %v1680_v35  ;;  %vm1699_vm15 = vc.u32 %v4032_v58, %v4037_v32 }
 0x22c   : > { %v4646_v59 = vand.u32 2147483647, %v3729_v18  ;;  %v4093_v5 = vshrl.u32 %v1495_v29, 30  ;;  %v1783_v26 = vsel %vm1781_vm7, %v1771_v20, 2102212464  ;;  %v4097_v37 = vsub.s32 32, %v1864_v39 }
 0x22d   : > { %v1966_v27 = vsel %vm1965_vm13, %v1964_v2, 0  ;;  %v4100_v57 = vmul.u32.u64.low %v4078_v40, %v1793_v52  ;;  %v4101_v12 = vmul.u32.u64.high %v4078_v40, %v1793_v52, %v4100_v57  ;;  %v1599_v7 = vadd.s32 536870912, %v4076_v25 }
 0x22e   : > { %v4104_v9 = vmul.u32.u64.low %v4078_v40, %v1789_v6  ;;  %v4105_v49 = vmul.u32.u64.high %v4078_v40, %v1789_v6, %v4104_v9  ;;  %v1697_v23 = vmul.u32 %v4011_v45, %v1681_v54  ;;  %v1701_v48 = vsel %vm1699_vm15, %v1700_v0, %v4038_v60 }
 0x22f   : > { %v1782_v20 = vsel %vm1778_vm14, %v1762_v36, %v1765_v47  ;;  %v1784_v2 = vsel %vm1780_vm9, %v1768_v28, %v1783_v26  ;;  %v1857_v62 = vand.u32 8388607, %v4646_v59  ;;  %v1968_v30 = vand.u32 31, %v1966_v27 }
 0x230   : > { %v2061_v29 = vand.u32 2139095040, %v3733_v14  ;;  %v1876_v63 = vshll.u32 %v4683_v61, %v1864_v39  ;;  %v1877_v35 = vshrl.u32 %v4653_v11, %v4097_v37  ;;  %v1879_v45 = vshll.u32 %v4653_v11, %v1864_v39 }
 0x231   : > { %v1880_v60 = vshrl.u32 %v4676_v17, %v4097_v37  ;;  %v4124_v47 = vshrl.u32 %v1862_v22, 5  ;;  %v1867_v28 = vshll.u32 %v4660_v1, %v1864_v39  ;;  %v1870_v0 = vshll.u32 %v4681_v4, %v1864_v39 }
 0x232   : > { %v4652_v36 = vand.u32 2147483647, %v3731_v56  ;;  %v1868_v6 = vshrl.u32 %v4681_v4, %v4097_v37  ;;  %v1871_v52 = vshrl.u32 %v4682_v8, %v4097_v37  ;;  %v1873_v54 = vshll.u32 %v4682_v8, %v1864_v39 }
 0x233   : > { %v1874_v26 = vshrl.u32 %v4683_v61, %v4097_v37  ;;  %v4137_v57 = vshrl.u32 %v1599_v7, 30  ;;  %v4139_v59 = vadd.s32 %v1701_v48, %v1697_v23  ;;  %v4141_v13 = vsub.s32 32, %v1968_v30 }
 0x234   : > { %v1785_v33 = vsel %vm1779_vm12, %v1782_v20, %v1784_v2  ;;  %v1878_v15 = vor.u32 %v1877_v35, %v1876_v63  ;;  %v1881_v51 = vor.u32 %v1880_v60, %v1879_v45  ;;  %v2062_v19 = vshrl.u32 %v2061_v29, 23 }
 0x235   : > { %vm1803_vm1 = vc.u32 %v4101_v12, %v4104_v9  ;;  %v1804_v39 = vadd.s32 1, %v4105_v49  ;;  %v1858_v31 = vor.u32 8388608, %v1857_v62  ;;  %vm1885_vm10 = vcmp.lt.s32.totalorder %v4124_v47, 4 }
 0x236   : > { %v1869_v7 = vor.u32 %v1868_v6, %v1867_v28  ;;  %v4149_v22 = vor.u32 %v1871_v52, %v1870_v0  ;;  %v1875_v23 = vor.u32 %v1874_v26, %v1873_v54  ;;  %v1961_v48 = vand.u32 8388607, %v4652_v36 }
 0x237   : > { %vm1882_vm2 = vcmp.lt.s32.totalorder %v4124_v47, 1  ;;  %vm1884_vm0 = vcmp.lt.s32.totalorder %v4124_v47, 3  ;;  %v1980_v55 = vshll.u32 %v4683_v61, %v1968_v30  ;;  %v1981_v20 = vshrl.u32 %v4653_v11, %v4141_v13 }
 0x238   : > { %v1891_v2 = vsel %vm1885_vm10, %v1878_v15, 920167782  ;;  %v1895_v62 = vsel %vm1885_vm10, %v1881_v51, 1326507024  ;;  %v4162_v29 = vshrl.u32 %v1966_v27, 5  ;;  %v2585_v63 = vadd.s32 4294967169, %v2062_v19 }
 0x239   : > { %v1971_v35 = vshll.u32 %v4660_v1, %v1968_v30  ;;  %v1972_v45 = vshrl.u32 %v4681_v4, %v4141_v13  ;;  %v1974_v60 = vshll.u32 %v4681_v4, %v1968_v30  ;;  %v1977_v28 = vshll.u32 %v4682_v8, %v1968_v30 }
 0x23a   : > { %v1975_v0 = vshrl.u32 %v4682_v8, %v4141_v13  ;;  %v1978_v6 = vshrl.u32 %v4683_v61, %v4141_v13  ;;  %v1983_v51 = vshll.u32 %v4653_v11, %v1968_v30  ;;  %v1984_v19 = vshrl.u32 %v4676_v17, %v4141_v13 }
 0x23b   : > { %v1801_v27 = vmul.u32 %v4078_v40, %v1785_v33  ;;  %v1805_v52 = vsel %vm1803_vm1, %v1804_v39, %v4105_v49  ;;  %v4181_v54 = vshll.u32 %v1858_v31, 8  ;;  %v1982_v26 = vor.u32 %v1981_v20, %v1980_v55 }
 0x23c   : > { %vm1883_vm3 = vcmp.lt.s32.totalorder %v4124_v47, 2  ;;  %v1890_v36 = vsel %vm1882_vm2, %v1869_v7, %v4149_v22  ;;  %v1962_v30 = vor.u32 8388608, %v1961_v48  ;;  %vm1989_vm4 = vcmp.lt.s32.totalorder %v4162_v29, 4 }
 0x23d   : > { %v1892_v33 = vsel %vm1884_vm0, %v1875_v23, %v1891_v2  ;;  %v1894_v40 = vsel %vm1882_vm2, %v4149_v22, %v1875_v23  ;;  %v1896_v31 = vsel %vm1884_vm0, %v1878_v15, %v1895_v62  ;;  %v1973_v49 = vor.u32 %v1972_v45, %v1971_v35 }
 0x23e   : > { %v1976_v39 = vor.u32 %v1975_v0, %v1974_v60  ;;  %v1979_v55 = vor.u32 %v1978_v6, %v1977_v28  ;;  %v1985_v20 = vor.u32 %v1984_v19, %v1983_v51  ;;  %v2068_v11 = vadd.s32 1, %v2585_v63 }
 0x23f   : > { %v1866_v48 = vshrl.u32 %v4660_v1, %v4097_v37  ;;  %vm1986_vm11 = vcmp.lt.s32.totalorder %v4162_v29, 1  ;;  %vm1988_vm6 = vcmp.lt.s32.totalorder %v4162_v29, 3  ;;  %v1995_v2 = vsel %vm1989_vm4, %v1982_v26, 920167782 }
 0x240   : > { %v4202_v56 = vadd.s32 536870912, %v4139_v59  ;;  %v1893_v15 = vsel %vm1883_vm3, %v1890_v36, %v1892_v33  ;;  %v4657_v62 = vand.u32 2147483647, %v3733_v14  ;;  %vm2069_vm7 = vcmp.gt.s32.totalorder %v2068_v11, 0 }
 0x241   : > { %v4207_v63 = vadd.s32 %v1805_v52, %v1801_v27  ;;  %v1897_v37 = vsel %vm1883_vm3, %v1894_v40, %v1896_v31  ;;  %vm1987_vm8 = vcmp.lt.s32.totalorder %v4162_v29, 2  ;;  %v2070_v35 = vsel %vm2069_vm7, %v2068_v11, 0 }
 0x242   : > { %v1994_v45 = vsel %vm1986_vm11, %v1973_v49, %v1976_v39  ;;  %v1996_v60 = vsel %vm1988_vm6, %v1979_v55, %v1995_v2  ;;  %v1999_v36 = vsel %vm1989_vm4, %v1985_v20, 1326507024  ;;  %v2072_v28 = vand.u32 31, %v2070_v35 }
 0x243   : > { %v1886_v0 = vsel %vm1882_vm2, %v1866_v48, %v1869_v7  ;;  %v4221_v6 = vmul.u32.u64.low %v4181_v54, %v1893_v15  ;;  %v4222_v51 = vmul.u32.u64.high %v4181_v54, %v1893_v15, %v4221_v6  ;;  %v4225_v19 = vshll.u32 %v1962_v30, 8 }
 0x244   : > { %v1887_v11 = vsel %vm1885_vm10, %v1875_v23, 2102212464  ;;  %v4230_v27 = vmul.u32.u64.low %v4181_v54, %v1897_v37  ;;  %v4231_v52 = vmul.u32.u64.high %v4181_v54, %v1897_v37, %v4230_v27  ;;  %v2073_v33 = vsub.s32 32, %v2072_v28 }
 0x245   : > { %v1997_v40 = vsel %vm1987_vm8, %v1994_v45, %v1996_v60  ;;  %v1998_v7 = vsel %vm1986_vm11, %v1976_v39, %v1979_v55  ;;  %v2000_v31 = vsel %vm1988_vm6, %v1982_v26, %v1999_v36  ;;  %v2065_v30 = vand.u32 8388607, %v4657_v62 }
 0x246   : > { %v2075_v20 = vshll.u32 %v4660_v1, %v2072_v28  ;;  %v2076_v23 = vshrl.u32 %v4681_v4, %v2073_v33  ;;  %v2078_v48 = vshll.u32 %v4681_v4, %v2072_v28  ;;  %v2079_v2 = vshrl.u32 %v4682_v8, %v2073_v33 }
 0x247   : > { %v1888_v15 = vsel %vm1884_vm0, %v4149_v22, %v1887_v11  ;;  %v1970_v37 = vshrl.u32 %v4660_v1, %v4141_v13  ;;  %v2071_v45 = vshrl.u32 %v2070_v35, 5  ;;  %v2084_v26 = vshll.u32 %v4683_v61, %v2072_v28 }
 0x248   : > { %v2001_v60 = vsel %vm1987_vm8, %v1998_v7, %v2000_v31  ;;  %v2081_v36 = vshll.u32 %v4682_v8, %v2072_v28  ;;  %v2082_v27 = vshrl.u32 %v4683_v61, %v2073_v33  ;;  %v4693_v4 = vmov 920167782  }
 0x249   : > { %v2085_v62 = vshrl.u32 %v4693_v4, %v2073_v33  ;;  %v1991_v14 = vsel %vm1989_vm4, %v1979_v55, 2102212464  ;;  %v4259_v22 = vmul.u32.u64.low %v4225_v19, %v1997_v40  ;;  %v4260_v11 = vmul.u32.u64.high %v4225_v19, %v1997_v40, %v4259_v22 }
 0x24a   : > { %v2087_v13 = vshll.u32 %v4693_v4, %v2072_v28  ;;  %v2066_v35 = vor.u32 8388608, %v2065_v30  ;;  %v2077_v1 = vor.u32 %v2076_v23, %v2075_v20  ;;  %v2080_v18 = vor.u32 %v2079_v2, %v2078_v48 }
 0x24b   : > { %v2088_v7 = vshrl.u32 %v4676_v17, %v2073_v33  ;;  %v4266_v8 = vmul.u32.u64.low %v4225_v19, %v2001_v60  ;;  %v4267_v61 = vmul.u32.u64.high %v4225_v19, %v2001_v60, %v4266_v8  ;;  %v2086_v31 = vor.u32 %v2085_v62, %v2084_v26 }
 0x24c   : > { %vm2090_vm14 = vcmp.lt.s32.totalorder %v2071_v45, 1  ;;  %v1889_v55 = vsel %vm1883_vm3, %v1886_v0, %v1888_v15  ;;  %v2083_v50 = vor.u32 %v2082_v27, %v2081_v36  ;;  %vm2093_vm9 = vcmp.lt.s32.totalorder %v2071_v45, 4 }
 0x24d   : > { %v2089_v40 = vor.u32 %v2088_v7, %v2087_v13  ;;  %v1990_v28 = vsel %vm1986_vm11, %v1970_v37, %v1973_v49  ;;  %v1992_v30 = vsel %vm1988_vm6, %v1976_v39, %v1991_v14  ;;  %v4694_v20 = vmov 683565275  }
 0x24e   : > { %v2074_v17 = vshrl.u32 %v4694_v20, %v2073_v33  ;;  %vm2092_vm12 = vcmp.lt.s32.totalorder %v2071_v45, 3  ;;  %vm2091_vm13 = vcmp.lt.s32.totalorder %v2071_v45, 2  ;;  %v2095_v23 = vsel %vm2093_vm9, %v2083_v50, 2102212464 }
 0x24f   : > { %v2098_v62 = vsel %vm2090_vm14, %v2077_v1, %v2080_v18  ;;  %v2106_v48 = vshll.u32 %v2066_v35, 8  ;;  %v1905_v47 = vmul.u32 %v4181_v54, %v1889_v55  ;;  %vm1907_vm15 = vc.u32 %v4231_v52, %v4221_v6 }
 0x250   : > { %v1908_v0 = vadd.s32 1, %v4222_v51  ;;  %v2099_v49 = vsel %vm2093_vm9, %v2086_v31, 920167782  ;;  %v1993_v14 = vsel %vm1987_vm8, %v1990_v28, %v1992_v30  ;;  %v2102_v33 = vsel %vm2090_vm14, %v2080_v18, %v2083_v50 }
 0x251   : > { %v2100_v39 = vsel %vm2092_vm12, %v2083_v50, %v2099_v49  ;;  %v2103_v2 = vsel %vm2093_vm9, %v2089_v40, 1326507024  ;;  %v2094_v15 = vsel %vm2090_vm14, %v2074_v17, %v2077_v1  ;;  %v2096_v54 = vsel %vm2092_vm12, %v2080_v18, %v2095_v23 }
 0x252   : > { %v2101_v37 = vsel %vm2091_vm13, %v2098_v62, %v2100_v39  ;;  %v2104_v26 = vsel %vm2092_vm12, %v2086_v31, %v2103_v2  ;;  %v2012_v60 = vadd.s32 1, %v4260_v11  ;;  %v1909_v50 = vsel %vm1907_vm15, %v1908_v0, %v4222_v51 }
 0x253   : > { %v2105_v36 = vsel %vm2091_vm13, %v2102_v33, %v2104_v26  ;;  %v4294_v29 = vmul.u32.u64.low %v2106_v48, %v2101_v37  ;;  %v4295_v27 = vmul.u32.u64.high %v2106_v48, %v2101_v37, %v4294_v29  ;;  %vm2011_vm1 = vc.u32 %v4267_v61, %v4259_v22 }
 0x254   : > { %v4301_v1 = vmul.u32.u64.low %v2106_v48, %v2105_v36  ;;  %v4302_v4 = vmul.u32.u64.high %v2106_v48, %v2105_v36, %v4301_v1  ;;  %v4695_v18 = vsub.s32 0, %v4054_v16  ;;  %v4308_v35 = vshrl.u32 %v4202_v56, 30 }
 0x255   : > { %v2097_v7 = vsel %vm2091_vm13, %v2094_v15, %v2096_v54  ;;  %v4696_v8 = vshll.u32 %v4093_v5, 30  ;;  %v1807_v51 = vadd.s32 536870912, %v4207_v63  ;;  %v2009_v55 = vmul.u32 %v4225_v19, %v1993_v14 }
 0x256   : > { %v2558_v13 = vmin.u32 %v4695_v18, %v4054_v16  ;;  %v1601_v40 = vshll.u32 %v4137_v57, 30  ;;  %v1910_v28 = vadd.s32 %v1909_v50, %v1905_v47  ;;  %v2013_v30 = vsel %vm2011_vm1, %v2012_v60, %v4260_v11 }
 0x257   : > { %v4314_v31 = vsub.s32 %v3954_v44, %v4696_v8  ;;  %v2116_v20 = vadd.s32 1, %v4295_v27  ;;  %v2113_v56 = vmul.u32 %v2106_v48, %v2097_v7  ;;  %vm2115_vm10 = vc.u32 %v4302_v4, %v4294_v29 }
 0x258   : > { %v1398_v45 = vclz %v2558_v13  ;;  %v1705_v17 = vshll.u32 %v4308_v35, 30  ;;  %v4325_v23 = vshrl.u32 %v1807_v51, 30  ;;  %v2014_v62 = vadd.s32 %v2013_v30, %v2009_v55 }
 0x259   : > { %v2117_v44 = vsel %vm2115_vm10, %v2116_v20, %v4295_v27  ;;  %v1500_v19 = vsub.s32 0, %v4314_v31  ;;  %v4329_v47 = vsub.s32 %v4076_v25, %v1601_v40  ;;  %v1911_v11 = vadd.s32 536870912, %v1910_v28 }
 0x25a   : > { %v2118_v0 = vadd.s32 %v2117_v44, %v2113_v56  ;;  %v2559_v49 = vadd.s32 4294967294, %v1398_v45  ;;  %v4332_v48 = vsub.s32 %v4139_v59, %v1705_v17  ;;  %v1809_v14 = vshll.u32 %v4325_v23, 30 }
 0x25b   : > { %v2015_v39 = vadd.s32 536870912, %v2014_v62  ;;  %v2562_v33 = vmin.u32 %v1500_v19, %v4314_v31  ;;  %v1604_v2 = vsub.s32 0, %v4329_v47  ;;  %v4337_v15 = vshrl.u32 %v1911_v11, 30 }
 0x25c   : > { %v2119_v54 = vadd.s32 536870912, %v2118_v0  ;;  %vm2560_vm2 = vcmp.lt.s32.totalorder %v2559_v49, 0  ;;  %v1708_v25 = vsub.s32 0, %v4332_v48  ;;  %v4341_v37 = vsub.s32 %v4207_v63, %v1809_v14 }
 0x25d   : > { %v4343_v26 = vshrl.u32 %v2015_v39, 30  ;;  %v1502_v59 = vclz %v2562_v33  ;;  %v2566_v60 = vmin.u32 %v1604_v2, %v4329_v47  ;;  %v1913_v36 = vshll.u32 %v4337_v15, 30 }
 0x25e   : > { %v1401_v27 = vsel %vm2560_vm2, 0, %v2559_v49  ;;  %v4347_v50 = vshrl.u32 %v2119_v54, 30  ;;  %v2570_v1 = vmin.u32 %v1708_v25, %v4332_v48  ;;  %v1812_v18 = vsub.s32 0, %v4341_v37 }
 0x25f   : > { %v2017_v13 = vshll.u32 %v4343_v26, 30  ;;  %v1406_v7 = vsub.s32 4294967266, %v1401_v27  ;;  %v2563_v8 = vadd.s32 4294967294, %v1502_v59  ;;  %v1606_v63 = vclz %v2566_v60 }
 0x260   : > { %v4352_v51 = vsub.s32 %v1910_v28, %v1913_v36  ;;  %v2121_v55 = vshll.u32 %v4347_v50, 30  ;;  %v1710_v40 = vclz %v2570_v1  ;;  %v1386_v30 = vadd.s32 %v3802_v34, %v3821_v46 }
 0x261   : > { %v1402_v20 = vsub.s32 32, %v1401_v27  ;;  %v2574_v56 = vmin.u32 %v1812_v18, %v4341_v37  ;;  %v4358_v45 = vsub.s32 %v2014_v62, %v2017_v13  ;;  %v1407_v17 = vadd.s32 127, %v1406_v7 }
 0x262   : > { %vm2564_vm0 = vcmp.lt.s32.totalorder %v2563_v8, 0  ;;  %v2567_v44 = vadd.s32 4294967294, %v1606_v63  ;;  %v1916_v19 = vsub.s32 0, %v4352_v51  ;;  %v4361_v11 = vsub.s32 %v2118_v0, %v2121_v55 }
 0x263   : > { %v2571_v28 = vadd.s32 4294967294, %v1710_v40  ;;  %v1403_v49 = vshll.u32 %v4054_v16, %v1401_v27  ;;  %v1505_v14 = vsel %vm2564_vm0, 0, %v2563_v8  ;;  %v1814_v39 = vclz %v2574_v56 }
 0x264   : > { %v2020_v33 = vsub.s32 0, %v4358_v45  ;;  %v1404_v34 = vshrl.u32 %v1386_v30, %v1402_v20  ;;  %v1408_v46 = vshll.u32 %v1407_v17, 23  ;;  %vm2568_vm3 = vcmp.lt.s32.totalorder %v2567_v44, 0 }
 0x265   : > { %v2578_v62 = vmin.u32 %v1916_v19, %v4352_v51  ;;  %v2124_v2 = vsub.s32 0, %v4361_v11  ;;  %v1510_v54 = vsub.s32 4294967266, %v1505_v14  ;;  %vm2572_vm4 = vcmp.lt.s32.totalorder %v2571_v28, 0 }
 0x266   : > { %v1609_v25 = vsel %vm2568_vm3, 0, %v2567_v44  ;;  %v2575_v59 = vadd.s32 4294967294, %v1814_v39  ;;  %v2582_v0 = vmin.u32 %v2020_v33, %v4358_v45  ;;  %v1405_v60 = vor.u32 %v1404_v34, %v1403_v49 }
 0x267   : > { %v1409_v36 = vor.u32 4788187, %v1408_v46  ;;  %v1918_v16 = vclz %v2578_v62  ;;  %v1713_v27 = vsel %vm2572_vm4, 0, %v2571_v28  ;;  %v2586_v1 = vmin.u32 %v2124_v2, %v4361_v11 }
 0x268   : > { %v1490_v18 = vadd.s32 %v3868_v43, %v3874_v21  ;;  %v1506_v13 = vsub.s32 32, %v1505_v14  ;;  %v1511_v7 = vadd.s32 127, %v1510_v54  ;;  %v1614_v8 = vsub.s32 4294967266, %v1609_v25 }
 0x269   : > { %vm2576_vm11 = vcmp.lt.s32.totalorder %v2575_v59, 0  ;;  %v2022_v63 = vclz %v2582_v0  ;;  %v1410_v55 = vand.u32 2147483647, %v1409_v36  ;;  %v1412_v40 = vcvt.s32.f32 %v1405_v60 }
 0x26a   : > { %v1718_v30 = vsub.s32 4294967266, %v1713_v27  ;;  %v2579_v20 = vadd.s32 4294967294, %v1918_v16  ;;  %v1507_v56 = vshll.u32 %v4314_v31, %v1505_v14  ;;  %v1594_v17 = vadd.s32 %v3983_v24, %v3976_v41 }
 0x26b   : > { %v1610_v44 = vsub.s32 32, %v1609_v25  ;;  %v2126_v19 = vclz %v2586_v1  ;;  %v1508_v28 = vshrl.u32 %v1490_v18, %v1506_v13  ;;  %v1512_v49 = vshll.u32 %v1511_v7, 23 }
 0x26c   : > { %v1615_v39 = vadd.s32 127, %v1614_v8  ;;  %v1817_v43 = vsel %vm2576_vm11, 0, %v2575_v59  ;;  %v1698_v21 = vadd.s32 %v4037_v32, %v4032_v58  ;;  %v1714_v33 = vsub.s32 32, %v1713_v27 }
 0x26d   : > { %v2583_v34 = vadd.s32 4294967294, %v2022_v63  ;;  %v1719_v46 = vadd.s32 127, %v1718_v30  ;;  %vm2580_vm6 = vcmp.lt.s32.totalorder %v2579_v20, 0  ;;  %v1611_v62 = vshll.u32 %v4329_v47, %v1609_v25 }
 0x26e   : > { %v1612_v2 = vshrl.u32 %v1594_v17, %v1610_v44  ;;  %v1822_v31 = vsub.s32 4294967266, %v1817_v43  ;;  %v2587_v14 = vadd.s32 4294967294, %v2126_v19  ;;  %v1413_v54 = vmul.f32 %v1412_v40, %v1410_v55 }
 0x26f   : > { %v1509_v41 = vor.u32 %v1508_v28, %v1507_v56  ;;  %v1513_v24 = vor.u32 4788187, %v1512_v49  ;;  %v1616_v0 = vshll.u32 %v1615_v39, 23  ;;  %v1715_v60 = vshll.u32 %v4332_v48, %v1713_v27 }
 0x270   : > { %v1716_v36 = vshrl.u32 %v1698_v21, %v1714_v33  ;;  %v4378_v59 = vsel %vm2580_vm6, 0, %v2579_v20  ;;  %vm2584_vm7 = vcmp.lt.s32.totalorder %v2583_v34, 0  ;;  %v1720_v58 = vshll.u32 %v1719_v46, 23 }
 0x271   : > { %v1802_v32 = vadd.s32 %v4104_v9, %v4101_v12  ;;  %v1818_v16 = vsub.s32 32, %v1817_v43  ;;  %vm1332_vm8 = vcmp.lt.s32.totalorder %v3436_v10, 0  ;;  %v1613_v47 = vor.u32 %v1612_v2, %v1611_v62 }
 0x272   : > { %v1823_v25 = vadd.s32 127, %v1822_v31  ;;  %vm2588_vm14 = vcmp.lt.s32.totalorder %v2587_v14, 0  ;;  %v4697_v1 = vand.u32 2147483647, %v3436_v10  ;;  %v1617_v48 = vor.u32 4788187, %v1616_v0 }
 0x273   : > { %v1926_v27 = vsub.s32 4294967266, %v4378_v59  ;;  %v4390_v13 = vsel %vm2584_vm7, 0, %v2583_v34  ;;  %v1414_v7 = vxor.u32 2147483648, %v1413_v54  ;;  %v1514_v8 = vand.u32 2147483647, %v1513_v24 }
 0x274   : > { %vm4385_vm9 = vcmp.le.f32.partialorder %v4697_v1, 0.7853982  ;;  %v1516_v12 = vcvt.s32.f32 %v1509_v41  ;;  %v1717_v9 = vor.u32 %v1716_v36, %v1715_v60  ;;  %v1721_v63 = vor.u32 4788187, %v1720_v58 }
 0x275   : > { %v1819_v55 = vshll.u32 %v4341_v37, %v1817_v43  ;;  %v1820_v40 = vshrl.u32 %v1802_v32, %v1818_v16  ;;  %v4393_v30 = vsel %vm2588_vm14, 0, %v2587_v14  ;;  %vm1436_vm12 = vcmp.lt.s32.totalorder %v3460_v3, 0 }
 0x276   : > { %v1620_v20 = vcvt.s32.f32 %v1613_v47  ;;  %v1824_v56 = vshll.u32 %v1823_v25, 23  ;;  %v2030_v17 = vsub.s32 4294967266, %v4390_v13  ;;  %v1618_v44 = vand.u32 2147483647, %v1617_v48 }
 0x277   : > { %v1906_v19 = vadd.s32 %v4221_v6, %v4231_v52  ;;  %v1922_v28 = vsub.s32 32, %v4378_v59  ;;  %v1927_v49 = vadd.s32 127, %v1926_v27  ;;  %v1415_v39 = vsel %vm1332_vm8, %v1414_v7, %v1413_v54 }
 0x278   : > { %v1416_v37 = vsub.s32 4, %v3906_v53  ;;  %vm1540_vm13 = vcmp.lt.s32.totalorder %v3552_v38, 0  ;;  %v2134_v43 = vsub.s32 4294967266, %v4393_v30  ;;  %v4700_v21 = vand.u32 2147483647, %v3460_v3 }
 0x279   : > { %v1517_v34 = vmul.f32 %v1516_v12, %v1514_v8  ;;  %v1722_v6 = vand.u32 2147483647, %v1721_v63  ;;  %v1724_v52 = vcvt.s32.f32 %v1717_v9  ;;  %v1821_v46 = vor.u32 %v1820_v40, %v1819_v55 }
 0x27a   : > { %vm4407_vm15 = vcmp.le.f32.partialorder %v4700_v21, 0.7853982  ;;  %v1825_v62 = vor.u32 4788187, %v1824_v56  ;;  %v2010_v2 = vadd.s32 %v4259_v22, %v4267_v61  ;;  %v2026_v31 = vsub.s32 32, %v4390_v13 }
 0x27b   : > { %v2031_v14 = vadd.s32 127, %v2030_v17  ;;  %v4703_v54 = vand.u32 2147483647, %v3552_v38  ;;  %v1621_v24 = vmul.f32 %v1620_v20, %v1618_v44  ;;  %v1923_v0 = vshll.u32 %v4352_v51, %v4378_v59 }
 0x27c   : > { %v1924_v60 = vshrl.u32 %v1906_v19, %v1922_v28  ;;  %v1928_v36 = vshll.u32 %v1927_v49, 23  ;;  %v1418_v58 = vsel %vm4385_vm9, %v3436_v10, %v1415_v39  ;;  %v4706_v22 = vand.u32 2147483647, %v3633_v42 }
 0x27d   : > { %vm4416_vm1 = vcmp.le.f32.partialorder %v4703_v54, 0.7853982  ;;  %v2114_v32 = vadd.s32 %v4294_v29, %v4302_v4  ;;  %v2130_v16 = vsub.s32 32, %v4393_v30  ;;  %v2135_v47 = vadd.s32 127, %v2134_v43 }
 0x27e   : > { %vm4427_vm10 = vcmp.le.f32.partialorder %v4706_v22, 0.7853982  ;;  %v1518_v25 = vxor.u32 2147483648, %v1517_v34  ;;  %v1725_v51 = vmul.f32 %v1724_v52, %v1722_v6  ;;  %v1728_v59 = vsub.s32 4, %v4308_v35 }
 0x27f   : > { %v1828_v1 = vcvt.s32.f32 %v1821_v46  ;;  %v1826_v48 = vand.u32 2147483647, %v1825_v62  ;;  %v2027_v27 = vshll.u32 %v4358_v45, %v4390_v13  ;;  %v2028_v7 = vshrl.u32 %v2010_v2, %v2026_v31  ;;  %v4709_v2 = vld [vmem:[#allocation2_spill] sm:$0xff] }
 0x280   : > { %v2032_v8 = vshll.u32 %v2031_v14, 23  ;;  %v1622_v12 = vxor.u32 2147483648, %v1621_v24  ;;  %vm1644_vm2 = vcmp.lt.s32.totalorder %v3633_v42, 0  ;;  %v1925_v9 = vor.u32 %v1924_v60, %v1923_v0 }
 0x281   : > { %v1929_v63 = vor.u32 4788187, %v1928_v36  ;;  %v1417_v29 = vsel %vm1332_vm8, %v1416_v37, %v3906_v53  ;;  %v2131_v4 = vshll.u32 %v4361_v11, %v4393_v30  ;;  %v2132_v55 = vshrl.u32 %v2114_v32, %v2130_v16 }
 0x282   : > { %v2136_v40 = vshll.u32 %v2135_v47, 23  ;;  %2758 = vcosq.f32 %v1418_v58  ;;  %v1519_v45 = vsel %vm1436_vm12, %v1518_v25, %v1517_v34  ;;  %v1520_v13 = vsub.s32 4, %v4093_v5  ;;  %v4713_v47 = vld [vmem:[#allocation3_spill] sm:$0xff] }
 0x283   : > { %v1726_v20 = vxor.u32 2147483648, %v1725_v51  ;;  %v1729_v56 = vsel %vm1644_vm2, %v1728_v59, %v4308_v35  ;;  %v1829_v17 = vmul.f32 %v1828_v1, %v1826_v48  ;;  %v2029_v44 = vor.u32 %v2028_v7, %v2027_v27 }
 0x284   : > { %v2033_v19 = vor.u32 4788187, %v2032_v8  ;;  %v1623_v53 = vsel %vm1540_vm13, %v1622_v12, %v1621_v24  ;;  %v1624_v11 = vsub.s32 4, %v4137_v57  ;;  %v1930_v30 = vand.u32 2147483647, %v1929_v63  ;;  %v4717_v8 = vld [vmem:[#allocation4_spill] sm:$0xff] }
 0x285   : > { %v1932_v28 = vcvt.s32.f32 %v1925_v9  ;;  %2760 = vsinq.f32 %v1418_v58  ;;  %v1522_v49 = vsel %vm4407_vm15, %v3460_v3, %v1519_v45  ;;  %v2133_v39 = vor.u32 %v2132_v55, %v2131_v4  ;;  %v4721_v45 = vld [vmem:[#allocation5_spill] sm:$0xff] }
 0x286   : > { %v2137_v37 = vor.u32 4788187, %v2136_v40  ;;  %v1419_v35 = vsel %vm4385_vm9, 0, %v1417_v29  ;;  %v1521_v43 = vsel %vm1436_vm12, %v1520_v13, %v4093_v5  ;;  %v1727_v21 = vsel %vm1644_vm2, %v1726_v20, %v1725_v51 }
 0x287   : > { %v1731_v34 = vsel %vm4427_vm10, 0, %v1729_v56  ;;  %v1626_v6 = vsel %vm4416_vm1, %v3552_v38, %v1623_v53  ;;  %v1830_v52 = vxor.u32 2147483648, %v1829_v17  ;;  %v2034_v46 = vand.u32 2147483647, %v2033_v19 }
 0x288   : > { %v2036_v62 = vcvt.s32.f32 %v2029_v44  ;;  %2762 = vsinq.f32 %v1522_v49  ;;  %v1625_v18 = vsel %vm1540_vm13, %v1624_v11, %v4137_v57  ;;  %vm1748_vm0 = vcmp.lt.s32.totalorder %v4709_v2, 0 }
 0x289   : > { %v1933_v5 = vmul.f32 %v1932_v28, %v1930_v30  ;;  %2764 = vcosq.f32 %v1522_v49  ;;  %v1730_v31 = vsel %vm4427_vm10, %v3633_v42, %v1727_v21  ;;  %v2138_v14 = vand.u32 2147483647, %v2137_v37 }
 0x28a   : > { %v2140_v54 = vcvt.s32.f32 %v2133_v39  ;;  %v1523_v24 = vsel %vm4407_vm15, 0, %v1521_v43  ;;  %2766 = vcosq.f32 %v1626_v6  ;;  %v1735_v0 = vadd.s32 3, %v1731_v34 }
 0x28b   : > { %v4710_v60 = vand.u32 2147483647, %v4709_v2  ;;  %2768 = vsinq.f32 %v1626_v6  ;;  %v1831_v57 = vsel %vm1748_vm0, %v1830_v52, %v1829_v17  ;;  %v2037_v58 = vmul.f32 %v2036_v62, %v2034_v46 }
 0x28c   : > { %v1423_v22 = vadd.s32 3, %v1419_v35  ;;  %v2759_v61 = vpop.eup %2758  ;;  %v1627_v32 = vsel %vm4416_vm1, 0, %v1625_v18  ;;  %2770 = vcosq.f32 %v1730_v31  ;;  %v1832_v33 = vsub.s32 4, %v4325_v23 }
 0x28d   : > { %vm4478_vm3 = vcmp.le.f32.partialorder %v4710_v60, 0.7853982  ;;  %v1934_v16 = vxor.u32 2147483648, %v1933_v5  ;;  %2772 = vsinq.f32 %v1730_v31  ;;  %vm1852_vm4 = vcmp.lt.s32.totalorder %v4713_v47, 0 }
 0x28e   : > { %v1936_v25 = vsub.s32 4, %v4337_v15  ;;  %v2141_v51 = vmul.f32 %v2140_v54, %v2138_v14  ;;  %v4489_v59 = vand.u32 3, %v1735_v0  ;;  %v1834_v1 = vsel %vm4478_vm3, %v4709_v2, %v1831_v57 }
 0x28f   : > { %v4714_v48 = vand.u32 2147483647, %v4713_v47  ;;  %v2040_v27 = vsub.s32 4, %v4343_v26  ;;  %v2761_v7 = vpop.eup %2760  ;;  %vm1956_vm6 = vcmp.lt.s32.totalorder %v4717_v8, 0  ;;  %v2038_v12 = vxor.u32 2147483648, %v2037_v58 }
 0x290   : > { %v4502_v9 = vand.u32 3, %v1423_v22  ;;  %v1527_v63 = vadd.s32 3, %v1523_v24  ;;  %v1833_v29 = vsel %vm1748_vm0, %v1832_v33, %v4325_v23  ;;  %v1935_v4 = vsel %vm1852_vm4, %v1934_v16, %v1933_v5 }
 0x291   : > { %vm4496_vm11 = vcmp.le.f32.partialorder %v4714_v48, 0.7853982  ;;  %v4718_v55 = vand.u32 2147483647, %v4717_v8  ;;  %vm2060_vm8 = vcmp.lt.s32.totalorder %v4721_v45, 0  ;;  %2774 = vcosq.f32 %v1834_v1 }
 0x292   : > { %v4519_v13 = vsel %vm1852_vm4, %v1936_v25, %v4337_v15  ;;  %v2142_v20 = vxor.u32 2147483648, %v2141_v51  ;;  %v1631_v56 = vadd.s32 3, %v1627_v32  ;;  %v2763_v23 = vpop.eup %2762  ;;  %2776 = vsinq.f32 %v1834_v1 }
 0x293   : > { %vm4511_vm7 = vcmp.le.f32.partialorder %v4718_v55, 0.7853982  ;;  %v2041_v17 = vsel %vm1956_vm6, %v2040_v27, %v4343_v26  ;;  %v1427_v44 = vxor.u32 2147483648, %v2761_v7  ;;  %v1430_v19 = vxor.u32 2147483648, %v2759_v61  ;;  %v2765_v53 = vpop.eup %2764 }
 0x294   : > { %v1938_v11 = vsel %vm4496_vm11, %v4713_v47, %v1935_v4  ;;  %v2039_v30 = vsel %vm1956_vm6, %v2038_v12, %v2037_v58  ;;  %vm1426_vm14 = vcmp.eq.s32.totalorder %v4502_v9, 0  ;;  %v4530_v15 = vand.u32 3, %v1527_v63  ;;  %v2767_v28 = vpop.eup %2766 }
 0x295   : > { %v1835_v49 = vsel %vm4478_vm3, 0, %v1833_v29  ;;  %v1939_v26 = vsel %vm4496_vm11, 0, %v4519_v13  ;;  %v4722_v39 = vand.u32 2147483647, %v4721_v45  ;;  %vm1429_vm12 = vcmp.eq.s32.totalorder %v4502_v9, 2  ;;  %v2769_v35 = vpop.eup %2768 }
 0x296   : > { %v2043_v43 = vsel %vm4511_vm7, 0, %v2041_v17  ;;  %v2143_v21 = vsel %vm2060_vm8, %v2142_v20, %v2141_v51  ;;  %v1531_v34 = vxor.u32 2147483648, %v2763_v23  ;;  %v1632_v6 = vand.u32 3, %v1631_v56  ;;  %v2771_v52 = vpop.eup %2770 }
 0x297   : > { %vm4539_vm9 = vcmp.le.f32.partialorder %v4722_v39, 0.7853982  ;;  %2778 = vcosq.f32 %v1938_v11  ;;  %v2042_v46 = vsel %vm4511_vm7, %v4717_v8, %v2039_v30  ;;  %vm1425_vm13 = vcmp.lt.s32.totalorder %v4502_v9, 2  ;;  %v2773_v18 = vpop.eup %2772 }
 0x298   : > { %v1428_v62 = vsel %vm1426_vm14, %v2759_v61, %v1427_v44  ;;  %2780 = vsinq.f32 %v1938_v11  ;;  %v2144_v5 = vsub.s32 4, %v4347_v50  ;;  %v1431_v31 = vsel %vm1429_vm12, %v1430_v19, %v2761_v7 }
 0x299   : > { %vm1530_vm15 = vcmp.eq.s32.totalorder %v4530_v15, 0  ;;  %v2146_v14 = vsel %vm4539_vm9, %v4721_v45, %v2143_v21  ;;  %vm1533_vm1 = vcmp.eq.s32.totalorder %v4530_v15, 2  ;;  %v1534_v54 = vxor.u32 2147483648, %v2765_v53 }
 0x29a   : > { %v1839_v24 = vadd.s32 3, %v1835_v49  ;;  %2782 = vcosq.f32 %v2042_v46  ;;  %vm1634_vm10 = vcmp.eq.s32.totalorder %v1632_v6, 0  ;;  %v1635_v0 = vxor.u32 2147483648, %v2769_v35 }
 0x29b   : > { %v1638_v60 = vxor.u32 2147483648, %v2767_v28  ;;  %2784 = vsinq.f32 %v2042_v46  ;;  %vm1637_vm2 = vcmp.eq.s32.totalorder %v1632_v6, 2  ;;  %v1739_v36 = vxor.u32 2147483648, %v2773_v18  ;;  %v2775_v58 = vpop.eup %2774 }
 0x29c   : > { %v1742_v57 = vxor.u32 2147483648, %v2771_v52  ;;  %v2145_v22 = vsel %vm2060_vm8, %v2144_v5, %v4347_v50  ;;  %2786 = vcosq.f32 %v2146_v14  ;;  %vm1738_vm0 = vcmp.eq.s32.totalorder %v4489_v59, 0  ;;  %v2777_v61 = vpop.eup %2776 }
 0x29d   : > { %vm1741_vm3 = vcmp.eq.s32.totalorder %v4489_v59, 2  ;;  %2788 = vsinq.f32 %v2146_v14  ;;  %vm1529_vm4 = vcmp.lt.s32.totalorder %v4530_v15, 2  ;;  %v1532_v32 = vsel %vm1530_vm15, %v2765_v53, %v1531_v34  ;;  %v2218_v15 = vpop.permute.xlu0 %2217 }
 0x29e   : > { %v1840_v33 = vand.u32 3, %v1839_v24  ;;  %v1535_v16 = vsel %vm1533_vm1, %v1534_v54, %v2763_v23  ;;  %vm1633_vm11 = vcmp.lt.s32.totalorder %v1632_v6, 2  ;;  %v1636_v25 = vsel %vm1634_vm10, %v2767_v28, %v1635_v0 }
 0x29f   : > { %vm1737_vm6 = vcmp.lt.s32.totalorder %v4489_v59, 2  ;;  %v2147_v50 = vsel %vm4539_vm9, 0, %v2145_v22  ;;  %v1639_v51 = vsel %vm1637_vm2, %v1638_v60, %v2769_v35  ;;  %v1740_v1 = vsel %vm1738_vm0, %v2771_v52, %v1739_v36 }
 0x2a0   : > { %v1743_v48 = vsel %vm1741_vm3, %v1742_v57, %v2773_v18  ;;  %v1843_v41 = vxor.u32 2147483648, %v2777_v61  ;;  %v1846_v27 = vxor.u32 2147483648, %v2775_v58  ;;  %v1943_v7 = vadd.s32 3, %v1939_v26 }
 0x2a1   : > { %v2047_v12 = vadd.s32 3, %v2043_v43  ;;  %v2779_v63 = vpop.eup %2778  ;;  %vm1422_vm7 = vweird.f32 %v3436_v10  ;;  %vm1526_vm8 = vweird.f32 %v3460_v3  ;;  %vm1842_vm14 = vcmp.eq.s32.totalorder %v1840_v33, 0  ;;  %v2223_v10 = vpop.permute.xlu1 %2222 }
 0x2a2   : > { %vm1845_vm12 = vcmp.eq.s32.totalorder %v1840_v33, 2  ;;  %v2781_v29 = vpop.eup %2780  ;;  %v1432_v4 = vsel %vm1425_vm13, %v1428_v62, %v1431_v31  ;;  %v1536_v55 = vsel %vm1529_vm4, %v1532_v32, %v1535_v16  ;;  %vm1630_vm9 = vweird.f32 %v3552_v38  ;;  %v2228_v32 = vpop.permute.xlu0 %2227 }
 0x2a3   : > { %vm1734_vm15 = vweird.f32 %v3633_v42  ;;  %v1640_v40 = vsel %vm1633_vm11, %v1636_v25, %v1639_v51  ;;  %v1744_v13 = vsel %vm1737_vm6, %v1740_v1, %v1743_v48  ;;  %vm1841_vm1 = vcmp.lt.s32.totalorder %v1840_v33, 2 }
 0x2a4   : > { %v2151_v20 = vadd.s32 3, %v2147_v50  ;;  %v2783_v56 = vpop.eup %2782  ;;  %v1844_v23 = vsel %vm1842_vm14, %v2775_v58, %v1843_v41  ;;  %v1847_v17 = vsel %vm1845_vm12, %v1846_v27, %v2777_v61  ;;  %v1944_v44 = vand.u32 3, %v1943_v7 }
 0x2a5   : > { %v2048_v9 = vand.u32 3, %v2047_v12  ;;  %v2785_v19 = vpop.eup %2784  ;;  %v1433_v53 = vsel %vm1422_vm7, nan, %v1432_v4  ;;  %v1537_v38 = vsel %vm1526_vm8, nan, %v1536_v55  ;;  %v1641_v42 = vsel %vm1630_vm9, nan, %v1640_v40  ;;  %v2233_v48 = vpop.permute.xlu1 %2232 }
 0x2a6   : > { %v2787_v11 = vpop.eup %2786  ;;  %v1745_v30 = vsel %vm1734_vm15, nan, %v1744_v13  ;;  %vm1838_vm13 = vweird.f32 %v4709_v2  ;;  %v1848_v49 = vsel %vm1841_vm1, %v1844_v23, %v1847_v17  ;;  %v1947_v26 = vxor.u32 2147483648, %v2781_v29 }
 0x2a7   : > { %v2789_v59 = vpop.eup %2788  ;;  %v1950_v39 = vxor.u32 2147483648, %v2779_v63  ;;  %v2152_v37 = vand.u32 3, %v2151_v20  ;;  %vm1946_vm10 = vcmp.eq.s32.totalorder %v1944_v44, 0  ;;  %vm1949_vm2 = vcmp.eq.s32.totalorder %v1944_v44, 2 }
 0x2a8   : > { %vm2050_vm0 = vcmp.eq.s32.totalorder %v2048_v9, 0  ;;  %v2051_v34 = vxor.u32 2147483648, %v2785_v19  ;;  %vm2053_vm3 = vcmp.eq.s32.totalorder %v2048_v9, 2  ;;  %v2054_v6 = vxor.u32 2147483648, %v2783_v56 }
 0x2a9   : > { %v2155_v18 = vxor.u32 2147483648, %v2789_v59  ;;  %v2158_v5 = vxor.u32 2147483648, %v2787_v11  ;;  %vm2154_vm4 = vcmp.eq.s32.totalorder %v2152_v37, 0  ;;  %vm2157_vm11 = vcmp.eq.s32.totalorder %v2152_v37, 2 }
 0x2aa   : > { %vm1945_vm6 = vcmp.lt.s32.totalorder %v1944_v44, 2  ;;  %v1948_v24 = vsel %vm1946_vm10, %v2779_v63, %v1947_v26  ;;  %v1951_v0 = vsel %vm1949_vm2, %v1950_v39, %v2781_v29  ;;  %vm2049_vm7 = vcmp.lt.s32.totalorder %v2048_v9, 2 }
 0x2ab   : > { %v2052_v36 = vsel %vm2050_vm0, %v2783_v56, %v2051_v34  ;;  %v2055_v57 = vsel %vm2053_vm3, %v2054_v6, %v2785_v19  ;;  %vm2153_vm8 = vcmp.lt.s32.totalorder %v2152_v37, 2  ;;  %v2156_v22 = vsel %vm2154_vm4, %v2787_v11, %v2155_v18  ;;  %v2322_v11 = vpop.permute.xlu0 %2321 }
 0x2ac   : > { %v2159_v61 = vsel %vm2157_vm11, %v2158_v5, %v2789_v59  ;;  %vm1942_vm14 = vweird.f32 %v4713_v47  ;;  %v1952_v16 = vsel %vm1945_vm6, %v1948_v24, %v1951_v0  ;;  %vm2046_vm12 = vweird.f32 %v4717_v8 }
 0x2ad   : > { %v2056_v1 = vsel %vm2049_vm7, %v2052_v36, %v2055_v57  ;;  %v1849_v41 = vsel %vm1838_vm13, nan, %v1848_v49  ;;  %vm2150_vm9 = vweird.f32 %v4721_v45  ;;  %v2160_v12 = vsel %vm2153_vm8, %v2156_v22, %v2159_v61  ;;  %v2313_v45 = vld [vmem:[%s4630_s5] sm:$0x1] }
 0x2ae   : > { %v1953_v47 = vsel %vm1942_vm14, nan, %v1952_v16  ;;  %v2057_v40 = vsel %vm2046_vm12, nan, %v2056_v1  ;;  %v2161_v20 = vsel %vm2150_vm9, nan, %v2160_v12  ;;  %v2324_v17 = vlaneseq }
 0x2af   : > { %v2838_v9 = vmov 1966171168  }
 0x2b0   : > { %v2325_v44 = vshrl.u32 %v2324_v17, 7  ;;  %v2376_v19 = vunpack.c.l.s4 %v2838_v9 }
 0x2ce   : > { %v2286_v28 = vpop.f32.mrb[4].mxu1 }
 0x2cf   : > { %v2287_v35 = vadd.f32 %v2286_v28, %v2218_v15  ;;  %v2288_v43 = vpop.f32.mrb[5].mxu1 }
 0x2d0   : > { %v2289_v3 = vadd.f32 %v2288_v43, %v2218_v15  ;;  %v2290_v21 = vpop.f32.mrb[6].mxu1 }
 0x2d1   : > { %v2305_v52 = vmul.f32 %v2287_v35, %v1433_v53  ;;  %v2291_v46 = vadd.f32 %v2290_v21, %v2223_v10  ;;  %v2292_v62 = vpop.f32.mrb[7].mxu1  ;;  %v2326_v53 = vsub.s32 0, %v2325_v44 }
 0x2d2   : > { %v2306_v31 = vmul.f32 %v2289_v3, %v1537_v38  ;;  %v2293_v14 = vadd.f32 %v2292_v62, %v2223_v10  ;;  %v2377_v38 = vunpack.c.0.s8 %v2376_v19 }
 0x2d3   : > { %v2307_v54 = vmul.f32 %v2291_v46, %v1641_v42  ;;  %v2327_v42 = vrot.slane %v2322_v11, %v2326_v53 }
 0x2d4   : > { %v2308_v60 = vmul.f32 %v2293_v14, %v1745_v30  ;;  %v2380_v49 = vsub.s32 %v2377_v38, %v2325_v44 }
 0x2d5   : > { %v2314_v58 = vpack.c.bf16 %v2307_v54, %v2305_v52 }
 0x2d6   : > { %v2296_v33 = vpop.f32.mrb[8].mxu1  ;;  %v2315_v25 = vpack.c.bf16 %v2308_v60, %v2306_v31 }
 0x2d7   : > { %v2297_v50 = vadd.f32 %v2296_v33, %v2228_v32  ;;  %v2298_v51 = vpop.f32.mrb[9].mxu1 }
 0x2d8   : > { %v2299_v27 = vadd.f32 %v2298_v51, %v2228_v32  ;;  %v2300_v7 = vpop.f32.mrb[10].mxu1  ;;  %2331 = vmatprep.subr.bf16.mxu1 %v2315_v25 }
 0x2d9   : > { %v2309_v63 = vmul.f32 %v2297_v50, %v1849_v41  ;;  %v2301_v29 = vadd.f32 %v2300_v7, %v2233_v48  ;;  %v2302_v4 = vpop.f32.mrb[11].mxu1  ;;  %2332 = vmatpush1.bf16.msra.mxu1 %v2314_v58 }
 0x2da   : > { %v2310_v55 = vmul.f32 %v2299_v27, %v1953_v47  ;;  %v2303_v8 = vadd.f32 %v2302_v4, %v2233_v48 }
 0x2db   : > { %v2311_v13 = vmul.f32 %v2301_v29, %v2057_v40 }
 0x2dc   : > { %v2312_v56 = vmul.f32 %v2303_v8, %v2161_v20 }
 0x2dd   : > { %v2316_v2 = vpack.c.bf16 %v2311_v13, %v2309_v63 }
 0x2de   : > { %v2317_v23 = vpack.c.bf16 %v2312_v56, %v2310_v55 }
 0x2e0   : > { %2333 = vmatprep.subr.bf16.mxu1 %v2317_v23 }
 0x2e1   : > { %2334 = vmatpush1.bf16.msra.mxu1 %v2316_v2 }
 0x2e4   : > { %2597 = vmatmul.mubr.msk.bf16.vlgmr.msra.gmra.mrb[12].mxu1 %vm2245_vm5, %v2313_v45  ;;  %vm2392_vm5 = vcmp.lt.s32.totalorder %v2324_v17, 256 }
 0x3b7   : > { %v2365_v30 = vpop.f32.mrb[12].mxu1 }
 0x3b8   : > { %v2366_v59 = vadd.f32 %v2365_v30, %v2327_v42  ;;  %v2367_v15 = vpop.f32.mrb[13].mxu1 }
 0x3b9   : > { %v2368_v28 = vadd.f32 %v2367_v15, %v2327_v42  ;;  %v2369_v26 = vpop.f32.mrb[14].mxu1 }
 0x3ba   : > { %v2370_v39 = vpop.f32.mrb[15].mxu1 }
 0x3bb   : > { %v2374_v37 = vcombine.low %v2366_v59, %v2368_v28 }
 0x3bd   : > { %v2381_v35 = vrot.slane %v2374_v37, %v2380_v49 }
 0x3bf   : > { %v2388_v43 = vrot.slane %v2381_v35, %v2380_v49 }
 0x3c1   : > { %2394 = vst.msk [vmem:[%s321_s20] sm:$0x3] %vm2392_vm5, %v2388_v43 }
 0x3c2 PF: > { %s16_s25 = sadd.s32 1, %s2828_s25   ;;  %s4725_s21 = smov %s2820_s23 }
 0x3c3   : > { %p13_p7 = scmp.ge.s32.totalorder %s16_s25, 10   ;;  %s4726_s22 = smov %s2824_s24 }
 0x3c4   : > { %s4727_s23 = smov %s4730_s26  ;;  %s4728_s24 = smov %s4734_s27 }
 0x3c5   :  { %15 = sbr.rel (!%p13_p7) target bundleno = 3 (0x3), region = 81 }

</bundles_post_ra>
